<compile_context>
chip_gen: v7x
topology: tpu7x:2x2x1
jax: 0.10.0
libtpu: 0.0.40
codegen_flags: <defaults>
</compile_context>

<pallas_src>
import jax
import jax.numpy as jnp
from jax.experimental import pallas as pl
from jax.experimental.pallas import tpu as pltpu

LANE = 128          # padded hidden / output width (lane-dense)
IN_FEATURES = 784   # 28*28, full-array last dim for the x block


def mnist_mlp_kernel(x_ref,
                     w1_ref, b1_ref,
                     w2_ref, b2_ref,
                     w3_ref, b3_ref,
                     w4_ref, b4_ref,
                     o_ref):
    """Fused forward pass for one (TILE_B, 784) batch tile.

    x_ref, w*_ref are bf16 (MXU inputs); b*_ref and o_ref are f32.
    All hidden/output widths are padded to LANE=128 (padded cols/rows are 0).
    """
    x = x_ref[...]                                            # (TILE_B, 784) bf16

    # fc1 + sigmoid  (f32 accumulate, f32 elementwise)
    h = jnp.dot(x, w1_ref[...], preferred_element_type=jnp.float32) + b1_ref[...]
    h = jax.nn.sigmoid(h)

    # fc2 + sigmoid
    h = jnp.dot(h.astype(jnp.bfloat16), w2_ref[...],
                preferred_element_type=jnp.float32) + b2_ref[...]
    h = jax.nn.sigmoid(h)

    # fc3 + sigmoid
    h = jnp.dot(h.astype(jnp.bfloat16), w3_ref[...],
                preferred_element_type=jnp.float32) + b3_ref[...]
    h = jax.nn.sigmoid(h)

    # fc4 (no activation) -> lane-dense (TILE_B, 128) f32 store
    out = jnp.dot(h.astype(jnp.bfloat16), w4_ref[...],
                  preferred_element_type=jnp.float32) + b4_ref[...]
    o_ref[...] = out.astype(o_ref.dtype)


def mnist_net_forward(x, padded_params, *, tile_b=256):
    """x: (B, 784) f32. padded_params: dict of lane-padded bf16 W / f32 b.

    Returns (B, 10) f32 logits.
    """
    B = x.shape[0]
    n_tiles = pl.cdiv(B, tile_b)
    B_pad = n_tiles * tile_b
    if B_pad != B:
        x = jnp.pad(x, ((0, B_pad - B), (0, 0)))
    x_bf16 = x.astype(jnp.bfloat16)

    w1, b1 = padded_params["w1"], padded_params["b1"]
    w2, b2 = padded_params["w2"], padded_params["b2"]
    w3, b3 = padded_params["w3"], padded_params["b3"]
    w4, b4 = padded_params["w4"], padded_params["b4"]

    # Weights / biases: constant index_map -> loaded once, VMEM-resident.
    resident = lambda a: pl.BlockSpec(a.shape, lambda i: (0, 0))

    out_padded = pl.pallas_call(
        mnist_mlp_kernel,
        out_shape=jax.ShapeDtypeStruct((B_pad, LANE), jnp.float32),
        grid=(n_tiles,),
        in_specs=[
            pl.BlockSpec((tile_b, IN_FEATURES), lambda i: (i, 0)),  # streamed x
            resident(w1), resident(b1),
            resident(w2), resident(b2),
            resident(w3), resident(b3),
            resident(w4), resident(b4),
        ],
        out_specs=pl.BlockSpec((tile_b, LANE), lambda i: (i, 0)),
        compiler_params=pltpu.CompilerParams(
            dimension_semantics=("parallel",),     # 2 TCs on v7x; no-op elsewhere
            vmem_limit_bytes=32 << 20,
        ),
    )(x_bf16, w1, b1, w2, b2, w3, b3, w4, b4)

    return out_padded[:B, :10]


# ---------------------------------------------------------------------------
# Parameter setup (plain JAX glue, outside the kernel)
# ---------------------------------------------------------------------------

_DIMS = [(784, 100), (100, 60), (60, 20), (20, 10)]


def init_params(key):
    """PyTorch nn.Linear-style init, but stored as (in, out) so y = x @ W + b."""
    params = {}
    keys = jax.random.split(key, 2 * len(_DIMS))
    for i, (fan_in, fan_out) in enumerate(_DIMS):
        bound = 1.0 / jnp.sqrt(fan_in)
        w = jax.random.uniform(keys[2 * i], (fan_in, fan_out),
                               minval=-bound, maxval=bound, dtype=jnp.float32)
        b = jax.random.uniform(keys[2 * i + 1], (1, fan_out),
                               minval=-bound, maxval=bound, dtype=jnp.float32)
        params[f"w{i + 1}"] = w
        params[f"b{i + 1}"] = b
    return params


def pad_params_for_kernel(params):
    """Zero-pad every hidden/output width (and matching input rows) to LANE=128,
    cast weights to bf16 (MXU inputs), keep biases f32."""
    padded = {}
    for i, (fan_in, fan_out) in enumerate(_DIMS, start=1):
        w = params[f"w{i}"]
        b = params[f"b{i}"]
        in_pad = IN_FEATURES if i == 1 else LANE   # rows must match previous padded width
        w_p = jnp.zeros((in_pad, LANE), jnp.float32).at[:fan_in, :fan_out].set(w)
        b_p = jnp.zeros((1, LANE), jnp.float32).at[:, :fan_out].set(b)
        padded[f"w{i}"] = w_p.astype(jnp.bfloat16)
        padded[f"b{i}"] = b_p                       # f32 bias (added to f32 accumulator)
    return padded


def reference_forward(x, params, *, matmul_dtype=jnp.float32):
    """Pure-JAX reference. matmul_dtype=bf16 mirrors the kernel's MXU inputs."""
    def dot(a, w):
        return jnp.dot(a.astype(matmul_dtype), w.astype(matmul_dtype),
                       preferred_element_type=jnp.float32)
    h = jax.nn.sigmoid(dot(x, params["w1"]) + params["b1"])
    h = jax.nn.sigmoid(dot(h, params["w2"]) + params["b2"])
    h = jax.nn.sigmoid(dot(h, params["w3"]) + params["b3"])
    return dot(h, params["w4"]) + params["b4"]


if __name__ == "__main__":
    key = jax.random.PRNGKey(0)
    k_params, k_x = jax.random.split(key)

    params = init_params(k_params)
    padded_params = pad_params_for_kernel(params)

    B, TILE_B = 512, 256                       # 2 grid steps; fills MXU rows
    x = jax.random.normal(k_x, (B, IN_FEATURES), dtype=jnp.float32)

    out = mnist_net_forward(x, padded_params, tile_b=TILE_B)
    out = jax.block_until_ready(out)
    assert out.shape == (B, 10)

    # Check against a pure-JAX reference that uses the same bf16 matmul inputs.
    ref_bf16 = reference_forward(x, params, matmul_dtype=jnp.bfloat16)
    assert jnp.allclose(out, ref_bf16, atol=1e-2, rtol=1e-2), (
        float(jnp.max(jnp.abs(out - ref_bf16))))

    # Loose check against the full-f32 math (bf16 quantization error only).
    ref_f32 = reference_forward(x, params, matmul_dtype=jnp.float32)
    assert jnp.allclose(out, ref_f32, atol=5e-2, rtol=5e-2), (
        float(jnp.max(jnp.abs(out - ref_f32))))

    print("KERNEL_OK")
</pallas_src>

<mosaic_0001>
module attributes {stable_mosaic.version = 11 : i64} {
  func.func @mnist_mlp_kernel(%arg0: i32, %arg1: memref<256x784xbf16, #tpu.memory_space<vmem>>, %arg2: memref<784x128xbf16, #tpu.memory_space<vmem>>, %arg3: memref<1x128xf32, #tpu.memory_space<vmem>>, %arg4: memref<128x128xbf16, #tpu.memory_space<vmem>>, %arg5: memref<1x128xf32, #tpu.memory_space<vmem>>, %arg6: memref<128x128xbf16, #tpu.memory_space<vmem>>, %arg7: memref<1x128xf32, #tpu.memory_space<vmem>>, %arg8: memref<128x128xbf16, #tpu.memory_space<vmem>>, %arg9: memref<1x128xf32, #tpu.memory_space<vmem>>, %arg10: memref<256x128xf32, #tpu.memory_space<vmem>>) attributes {dimension_semantics = [#tpu.dimension_semantics<parallel>], iteration_bounds = array<i64: 2>, scalar_prefetch = 0 : i64, scratch_operands = 0 : i64, tpu.core_type = #tpu.core_type<tc>, window_params = [{transform_indices = @transform_0, window_bounds = array<i64: 256, 784>}, {pipeline_mode = #tpu.pipeline_mode<synchronous>, transform_indices = @transform_1, window_bounds = array<i64: 784, 128>}, {pipeline_mode = #tpu.pipeline_mode<synchronous>, transform_indices = @transform_2, window_bounds = array<i64: 1, 128>}, {pipeline_mode = #tpu.pipeline_mode<synchronous>, transform_indices = @transform_3, window_bounds = array<i64: 128, 128>}, {pipeline_mode = #tpu.pipeline_mode<synchronous>, transform_indices = @transform_4, window_bounds = array<i64: 1, 128>}, {pipeline_mode = #tpu.pipeline_mode<synchronous>, transform_indices = @transform_5, window_bounds = array<i64: 128, 128>}, {pipeline_mode = #tpu.pipeline_mode<synchronous>, transform_indices = @transform_6, window_bounds = array<i64: 1, 128>}, {pipeline_mode = #tpu.pipeline_mode<synchronous>, transform_indices = @transform_7, window_bounds = array<i64: 128, 128>}, {pipeline_mode = #tpu.pipeline_mode<synchronous>, transform_indices = @transform_8, window_bounds = array<i64: 1, 128>}, {transform_indices = @transform_9, window_bounds = array<i64: 256, 128>}]} {
    %c0 = arith.constant 0 : index
    %c0_0 = arith.constant 0 : index
    %0 = vector.load %arg1[%c0, %c0_0] : memref<256x784xbf16, #tpu.memory_space<vmem>>, vector<256x784xbf16>
    %c0_1 = arith.constant 0 : index
    %c0_2 = arith.constant 0 : index
    %1 = vector.load %arg2[%c0_1, %c0_2] : memref<784x128xbf16, #tpu.memory_space<vmem>>, vector<784x128xbf16>
    %cst = arith.constant dense<0.000000e+00> : vector<256x128xf32>
    %2 = tpu.matmul %0, %1, %cst {dimension_numbers = #tpu.dot_dimension_numbers<[1], [0], [0], [1], [0, 0, 1, 1], [], []>} : vector<256x784xbf16>, vector<784x128xbf16>, vector<256x128xf32> -> vector<256x128xf32>
    %c0_3 = arith.constant 0 : index
    %c0_4 = arith.constant 0 : index
    %3 = vector.load %arg3[%c0_3, %c0_4] : memref<1x128xf32, #tpu.memory_space<vmem>>, vector<1x128xf32>
    %4 = vector.broadcast %3 : vector<1x128xf32> to vector<256x128xf32>
    %5 = arith.addf %2, %4 : vector<256x128xf32>
    %6 = arith.negf %5 : vector<256x128xf32>
    %7 = math.exp %6 : vector<256x128xf32>
    %cst_5 = arith.constant 1.000000e+00 : f32
    %8 = vector.broadcast %cst_5 : f32 to vector<256x128xf32>
    %9 = arith.addf %8, %7 : vector<256x128xf32>
    %10 = arith.divf %8, %9 : vector<256x128xf32>
    %11 = arith.truncf %10 : vector<256x128xf32> to vector<256x128xbf16>
    %c0_6 = arith.constant 0 : index
    %c0_7 = arith.constant 0 : index
    %12 = vector.load %arg4[%c0_6, %c0_7] : memref<128x128xbf16, #tpu.memory_space<vmem>>, vector<128x128xbf16>
    %cst_8 = arith.constant dense<0.000000e+00> : vector<256x128xf32>
    %13 = tpu.matmul %11, %12, %cst_8 {dimension_numbers = #tpu.dot_dimension_numbers<[1], [0], [0], [1], [0, 0, 1, 1], [], []>} : vector<256x128xbf16>, vector<128x128xbf16>, vector<256x128xf32> -> vector<256x128xf32>
    %c0_9 = arith.constant 0 : index
    %c0_10 = arith.constant 0 : index
    %14 = vector.load %arg5[%c0_9, %c0_10] : memref<1x128xf32, #tpu.memory_space<vmem>>, vector<1x128xf32>
    %15 = vector.broadcast %14 : vector<1x128xf32> to vector<256x128xf32>
    %16 = arith.addf %13, %15 : vector<256x128xf32>
    %17 = arith.negf %16 : vector<256x128xf32>
    %18 = math.exp %17 : vector<256x128xf32>
    %cst_11 = arith.constant 1.000000e+00 : f32
    %19 = vector.broadcast %cst_11 : f32 to vector<256x128xf32>
    %20 = arith.addf %19, %18 : vector<256x128xf32>
    %21 = arith.divf %19, %20 : vector<256x128xf32>
    %22 = arith.truncf %21 : vector<256x128xf32> to vector<256x128xbf16>
    %c0_12 = arith.constant 0 : index
    %c0_13 = arith.constant 0 : index
    %23 = vector.load %arg6[%c0_12, %c0_13] : memref<128x128xbf16, #tpu.memory_space<vmem>>, vector<128x128xbf16>
    %cst_14 = arith.constant dense<0.000000e+00> : vector<256x128xf32>
    %24 = tpu.matmul %22, %23, %cst_14 {dimension_numbers = #tpu.dot_dimension_numbers<[1], [0], [0], [1], [0, 0, 1, 1], [], []>} : vector<256x128xbf16>, vector<128x128xbf16>, vector<256x128xf32> -> vector<256x128xf32>
    %c0_15 = arith.constant 0 : index
    %c0_16 = arith.constant 0 : index
    %25 = vector.load %arg7[%c0_15, %c0_16] : memref<1x128xf32, #tpu.memory_space<vmem>>, vector<1x128xf32>
    %26 = vector.broadcast %25 : vector<1x128xf32> to vector<256x128xf32>
    %27 = arith.addf %24, %26 : vector<256x128xf32>
    %28 = arith.negf %27 : vector<256x128xf32>
    %29 = math.exp %28 : vector<256x128xf32>
    %cst_17 = arith.constant 1.000000e+00 : f32
    %30 = vector.broadcast %cst_17 : f32 to vector<256x128xf32>
    %31 = arith.addf %30, %29 : vector<256x128xf32>
    %32 = arith.divf %30, %31 : vector<256x128xf32>
    %33 = arith.truncf %32 : vector<256x128xf32> to vector<256x128xbf16>
    %c0_18 = arith.constant 0 : index
    %c0_19 = arith.constant 0 : index
    %34 = vector.load %arg8[%c0_18, %c0_19] : memref<128x128xbf16, #tpu.memory_space<vmem>>, vector<128x128xbf16>
    %cst_20 = arith.constant dense<0.000000e+00> : vector<256x128xf32>
    %35 = tpu.matmul %33, %34, %cst_20 {dimension_numbers = #tpu.dot_dimension_numbers<[1], [0], [0], [1], [0, 0, 1, 1], [], []>} : vector<256x128xbf16>, vector<128x128xbf16>, vector<256x128xf32> -> vector<256x128xf32>
    %c0_21 = arith.constant 0 : index
    %c0_22 = arith.constant 0 : index
    %36 = vector.load %arg9[%c0_21, %c0_22] : memref<1x128xf32, #tpu.memory_space<vmem>>, vector<1x128xf32>
    %37 = vector.broadcast %36 : vector<1x128xf32> to vector<256x128xf32>
    %38 = arith.addf %35, %37 : vector<256x128xf32>
    %c0_23 = arith.constant 0 : index
    %c0_24 = arith.constant 0 : index
    %39 = vector.load %arg10[%c0_23, %c0_24] : memref<256x128xf32, #tpu.memory_space<vmem>>, vector<256x128xf32>
    tpu.vector_store %arg10[%c0_23, %c0_24], %38 {strides = array<i32>} : memref<256x128xf32, #tpu.memory_space<vmem>>, vector<256x128xf32>,
    return
  }
  func.func @transform_0(%arg0: i32) -> (i32, i32) {
    %c0_i32 = arith.constant 0 : i32
    %c0_i32_0 = arith.constant 0 : i32
    return %arg0, %c0_i32 : i32, i32
  }
  func.func @transform_1(%arg0: i32) -> (i32, i32) {
    %c0_i32 = arith.constant 0 : i32
    %c0_i32_0 = arith.constant 0 : i32
    %c0_i32_1 = arith.constant 0 : i32
    return %c0_i32, %c0_i32_0 : i32, i32
  }
  func.func @transform_2(%arg0: i32) -> (i32, i32) {
    %c0_i32 = arith.constant 0 : i32
    %c0_i32_0 = arith.constant 0 : i32
    %c0_i32_1 = arith.constant 0 : i32
    return %c0_i32, %c0_i32_0 : i32, i32
  }
  func.func @transform_3(%arg0: i32) -> (i32, i32) {
    %c0_i32 = arith.constant 0 : i32
    %c0_i32_0 = arith.constant 0 : i32
    %c0_i32_1 = arith.constant 0 : i32
    return %c0_i32, %c0_i32_0 : i32, i32
  }
  func.func @transform_4(%arg0: i32) -> (i32, i32) {
    %c0_i32 = arith.constant 0 : i32
    %c0_i32_0 = arith.constant 0 : i32
    %c0_i32_1 = arith.constant 0 : i32
    return %c0_i32, %c0_i32_0 : i32, i32
  }
  func.func @transform_5(%arg0: i32) -> (i32, i32) {
    %c0_i32 = arith.constant 0 : i32
    %c0_i32_0 = arith.constant 0 : i32
    %c0_i32_1 = arith.constant 0 : i32
    return %c0_i32, %c0_i32_0 : i32, i32
  }
  func.func @transform_6(%arg0: i32) -> (i32, i32) {
    %c0_i32 = arith.constant 0 : i32
    %c0_i32_0 = arith.constant 0 : i32
    %c0_i32_1 = arith.constant 0 : i32
    return %c0_i32, %c0_i32_0 : i32, i32
  }
  func.func @transform_7(%arg0: i32) -> (i32, i32) {
    %c0_i32 = arith.constant 0 : i32
    %c0_i32_0 = arith.constant 0 : i32
    %c0_i32_1 = arith.constant 0 : i32
    return %c0_i32, %c0_i32_0 : i32, i32
  }
  func.func @transform_8(%arg0: i32) -> (i32, i32) {
    %c0_i32 = arith.constant 0 : i32
    %c0_i32_0 = arith.constant 0 : i32
    %c0_i32_1 = arith.constant 0 : i32
    return %c0_i32, %c0_i32_0 : i32, i32
  }
  func.func @transform_9(%arg0: i32) -> (i32, i32) {
    %c0_i32 = arith.constant 0 : i32
    %c0_i32_0 = arith.constant 0 : i32
    return %arg0, %c0_i32 : i32, i32
  }
}

</mosaic_0001>

<bundles_post_ra>
// kernel: tpu_custom_call.1
= control target key start
LH: loop header
LB: loop body
LE: loop exit
PB: predicated region body
PF: predicated region fallthrough
CT: control target
= control target key end

     0   :  { %14 = vsyncpa [#allocation3], 0  ;;  %s6042_s0 = inlined_call_operand.vmem [shape: bf16[512,784], index: 0, kind: input, shape index: {}]   ;;  %s6043_s1 = inlined_call_operand.vmem [shape: bf16[784,128], index: 1, kind: input, shape index: {}]   ;;  %s6044_s2 = inlined_call_operand.vmem [shape: f32[1,128], index: 2, kind: input, shape index: {}]   ;;  %s6045_s3 = inlined_call_operand.vmem [shape: bf16[128,128], index: 3, kind: input, shape index: {}]   ;;  %s6046_s4 = inlined_call_operand.vmem [shape: f32[1,128], index: 4, kind: input, shape index: {}]   ;;  %s6047_s5 = inlined_call_operand.vmem [shape: bf16[128,128], index: 5, kind: input, shape index: {}]   ;;  %s6048_s6 = inlined_call_operand.vmem [shape: f32[1,128], index: 6, kind: input, shape index: {}]   ;;  %s6049_s7 = inlined_call_operand.vmem [shape: bf16[128,128], index: 7, kind: input, shape index: {}]   ;;  %s6050_s8 = inlined_call_operand.vmem [shape: f32[1,128], index: 8, kind: input, shape index: {}]   ;;  %s6051_s9 = inlined_call_operand.hbm [shape: f32[512,128], index: 9, kind: output, shape index: {}]  }
   0x1   :  { %16 = vsyncpa [#allocation3 + $0x1], 0  ;;  %s5239_s30 = smov 0   ;;  %s5241_s10 = smov 0  }
   0x2   :  { %s5243_s11 = smov 0   ;;  %s5245_s12 = smov 0  }
   0x3 LB: > { %s5260_s13 = sadd.s32 4294967295, %s5184_s12   ;;  %s3546_s14 = sadd.s32 4294967294, %s5184_s12   ;;  %s5184_s12 = sphi %s5245_s12, %s6057_s12   ;;  %s5180_s11 = sphi %s5243_s11, %s6056_s11   ;;  %s5176_s10 = sphi %s5241_s10, %s6055_s10   ;;  %s5172_s30 = sphi %s5239_s30, %s6054_s30  }
   0x4   : > { %s5264_s15 = sadd.s32 1, %s5184_s12   ;;  %s223_s16 = sadd.s32 1, %s5180_s11 }
   0x5   : > { %s220_s17 = ssub.s32 %s5184_s12, %s5264_s15  ;;  %p233_p0 = scmp.ne.s32.totalorder %s5180_s11, %s5176_s10 }
   0x6   : > { %p221_p1 = scmp.eq.s32.totalorder %s220_s17, 0  ;;  %p234_p2 = scmp.eq.s32.totalorder %s5260_s13, 1 }
   0x7   : > { %p239_p3 = scmp.ne.s32.totalorder %s5176_s10, %s5172_s30  ;;  %p240_p4 = scmp.eq.s32.totalorder %s3546_s14, 1 }
   0x8   : > { %s5275_s18 = scalar_select %p221_p1, %s5180_s11, %s223_s16  }
   0x9   : > { %p5277_p5 = por %p234_p2, %p233_p0  ;;  %p5281_p6 = por %p240_p4, %p239_p3 }
   0xa   : > { %p3549_p7 = scmp.ge.s32.totalorder %s5184_s12, 1  ;;  %p292_p8 = scmp.lt.s32.totalorder %s5184_s12, 3 }
   0xc   : > { %p293_p9 = pnand %p3549_p7, %p292_p8 }
   0xd   : > { %v4505_v0 = vld [vmem:[%s6043_s1 + $0x40] sm:$0xff] (!%p293_p9)   ;;  %v4509_v4 = vld [vmem:[%s6043_s1 + $0x48] sm:$0xff] (!%p293_p9)   ;;  %v4513_v8 = vld [vmem:[%s6043_s1 + $0x50] sm:$0xff] (!%p293_p9)   ;;  %s3551_s25 = sshll.u32 (!%p293_p9), %s5260_s13, 5  ;;  %vm1425_vm0 = vcmask (!%p293_p9), 130048   ;;  %s326_s29 = sand.u32 (!%p293_p9), 1, %s5176_s10  }
   0xe   : > { %296 = sbr.rel (%p293_p9) target bundleno = 1273 (0x4f9), region = 56  ;;  %v4506_v1 = vld [vmem:[%s6043_s1] sm:$0xff] (!%p293_p9)   ;;  %3860 = vmatprep.subr.bf16.mxu0 (!%p293_p9), %v4505_v0  ;;  %v4510_v5 = vld [vmem:[%s6043_s1 + $0x8] sm:$0xff] (!%p293_p9)   ;;  %v4514_v9 = vld [vmem:[%s6043_s1 + $0x10] sm:$0xff] (!%p293_p9)   ;;  %p330_p10 = scmp.lt.s32.totalorder (!%p293_p9), %s3551_s25, 63 }
   0xf   : > { %v4507_v2 = vld [vmem:[%s6043_s1 + $0xc0] sm:$0xff] (!%p293_p9)   ;;  %3861 = vmatpush3.bf16.msra.mxu0 (!%p293_p9), %v4506_v1  ;;  %v4511_v6 = vld [vmem:[%s6043_s1 + $0xc8] sm:$0xff] (!%p293_p9)   ;;  %v4515_v10 = vld [vmem:[%s6043_s1 + $0xd0] sm:$0xff] (!%p293_p9)   ;;  %s3550_s14 = sshll.u32 (!%p293_p9), %s326_s29, 8  ;;  %s3859_s21 = sshll.u32 (!%p293_p9), %s5260_s13, 12 }
  0x10   : > { %v4508_v3 = vld [vmem:[%s6043_s1 + $0x80] sm:$0xff] (!%p293_p9)   ;;  %3972 = vmatprep.subr.bf16.mxu1 (!%p293_p9), %v4507_v2  ;;  %3862 = vmatprep.subr.bf16.mxu0 (!%p293_p9), %v4509_v4  ;;  %v4512_v7 = vld [vmem:[%s6043_s1 + $0x88] sm:$0xff] (!%p293_p9)   ;;  %v4516_v11 = vld [vmem:[%s6043_s1 + $0x90] sm:$0xff] (!%p293_p9)   ;;  %s5926_s17 = scalar_lea.vmem (!%p293_p9), [#allocation2], %s3550_s14  ;;  %s5991_s27 = scalar_lea.hbm (!%p293_p9), %s6051_s9, %s3859_s21 }
  0x11   : > { %3973 = vmatpush3.bf16.msra.mxu1 (!%p293_p9), %v4508_v3  ;;  %v4517_v12 = vld [vmem:[%s6043_s1 + $0x58] sm:$0xff] (!%p293_p9)   ;;  %v4521_v16 = vld [vmem:[%s6043_s1 + $0x60] sm:$0xff] (!%p293_p9)   ;;  %v4525_v20 = vld [vmem:[%s6043_s1 + $0x68] sm:$0xff] (!%p293_p9)   ;;  %s3484_s22 = sshll.u32 (!%p293_p9), %s5926_s17, 4  ;;  %s6001_s13 = scalar_lea.sflag (!%p293_p9), [#allocation3], %s326_s29  ;;  %s5993_s22 = int_to_ptr.vmem [resolvable:$true] %s3484_s22 }
  0x12   : > { %3974 = vmatprep.subr.bf16.mxu1 (!%p293_p9), %v4511_v6  ;;  %v4518_v13 = vld [vmem:[%s6043_s1 + $0x18] sm:$0xff] (!%p293_p9)   ;;  %v4522_v17 = vld [vmem:[%s6043_s1 + $0x20] sm:$0xff] (!%p293_p9)   ;;  %v4526_v21 = vld [vmem:[%s6043_s1 + $0x28] sm:$0xff] (!%p293_p9)   ;;  %s5186_s28 = smov (!%p293_p9), [#allocation2]  }
  0x13   : > { %3863 = vmatpush3.bf16.msra.mxu0 (!%p293_p9), %v4510_v5  ;;  %v4519_v14 = vld [vmem:[%s6043_s1 + $0xd8] sm:$0xff] (!%p293_p9)   ;;  %v4523_v18 = vld [vmem:[%s6043_s1 + $0xe0] sm:$0xff] (!%p293_p9)   ;;  %v4527_v22 = vld [vmem:[%s6043_s1 + $0xe8] sm:$0xff] (!%p293_p9)   ;;  %s5126_s14 = sshll.u32 (!%p293_p9), %s5186_s28, 4  ;;  %s5127_s14 = int_to_ptr.vmem [resolvable:$false] %s5126_s14 }
  0x14   : > { %3864 = vmatprep.subr.bf16.mxu0 (!%p293_p9), %v4513_v8  ;;  %v4520_v15 = vld [vmem:[%s6043_s1 + $0x98] sm:$0xff] (!%p293_p9)   ;;  %v4524_v19 = vld [vmem:[%s6043_s1 + $0xa0] sm:$0xff] (!%p293_p9)   ;;  %v4528_v23 = vld [vmem:[%s6043_s1 + $0xa8] sm:$0xff] (!%p293_p9)   ;;  %p5129_p0 = scmp.lt.s32.totalorder (!%p293_p9), %s5993_s22, %s5127_s14 }
  0x15   : > { %3975 = vmatpush3.bf16.msra.mxu1 %v4512_v7  ;;  %s6059_s25 = smov (!%p330_p10, %s3551_s25), 63  ;;  %v4529_v24 = vld [vmem:[%s6043_s1 + $0x70] sm:$0xff]   ;;  %v4533_v28 = vld [vmem:[%s6043_s1 + $0x78] sm:$0xff]   ;;  %v4540_v34 = vld [vmem:[%s6043_s1 + $0x140] sm:$0xff]  }
  0x16   : > { %3976 = vmatprep.subr.bf16.mxu1 %v4515_v10  ;;  %s4463_s26 = smul.u32 28, %s6059_s25  ;;  %v4530_v25 = vld [vmem:[%s6043_s1 + $0x30] sm:$0xff]   ;;  %v4534_v29 = vld [vmem:[%s6043_s1 + $0x38] sm:$0xff]   ;;  %v4544_v37 = vld [vmem:[%s6043_s1 + $0x100] sm:$0xff]  }
  0x17   : > { %3865 = vmatpush3.bf16.msra.mxu0 %v4514_v9  ;;  %v4531_v26 = vld [vmem:[%s6043_s1 + $0xf0] sm:$0xff]   ;;  %v4535_v30 = vld [vmem:[%s6043_s1 + $0xf8] sm:$0xff]   ;;  %v4554_v42 = vld [vmem:[%s6043_s1 + $0x148] sm:$0xff]  }
  0x18   : > { %3866 = vmatprep.subr.bf16.mxu0 %v4517_v12  ;;  %v4532_v27 = vld [vmem:[%s6043_s1 + $0xb0] sm:$0xff]   ;;  %s5378_s24 = scalar_lea.vmem %s6042_s0, %s4463_s26  ;;  %v4539_v33 = vld [vmem:[%s6043_s1 + $0xb8] sm:$0xff]   ;;  %v4557_v45 = vld [vmem:[%s6043_s1 + $0x108] sm:$0xff]   ;;  %s5128_s26 = scalar_lea.vmem %s5127_s14, 8192 }
  0x19   : > { %3977 = vmatpush3.bf16.msra.mxu1 %v4516_v11  ;;  %v4536_v31 = vld [vmem:[%s5378_s24] ss:$28 sps:$4 sm:$0xff]   ;;  %v4541_v35 = vld [vmem:[%s5378_s24 + $0x8] ss:$28 sps:$4 sm:$0xff]   ;;  %v4547_v40 = vld [vmem:[%s5378_s24 + $0x38] ss:$28 sps:$4 sm:$0xff]  }
  0x1a   : > { %3978 = vmatprep.subr.bf16.mxu1 %v4519_v14  ;;  %v4538_v32 = vld [vmem:[%s5378_s24 + $0x4] ss:$28 sps:$4 sm:$0xff]   ;;  %v4543_v36 = vld [vmem:[%s5378_s24 + $0xc] ss:$28 sps:$4 sm:$0xff]   ;;  %v4545_v38 = vld [vmem:[%s5378_s24 + $0x3c] ss:$28 sps:$4 sm:$0xff]  }
  0x1b   : > { %3867 = vmatpush3.bf16.msra.mxu0 %v4518_v13  ;;  %1506 = vmatprep.mubr.bf16.mxu0 %v4538_v32  ;;  %v4548_v39 = vld [vmem:[%s5378_s24 + $0x44] ss:$28 sps:$4 sm:$0xff]   ;;  %v4551_v41 = vld [vmem:[%s5378_s24 + $0x74] ss:$28 sps:$4 sm:$0xff]   ;;  %v4555_v44 = vld [vmem:[%s5378_s24 + $0x7c] ss:$28 sps:$4 sm:$0xff]  }
  0x1c   : > { %3868 = vmatprep.subr.bf16.mxu0 %v4521_v16  ;;  %1667 = vmatprep.mubr.bf16.mxu1 %v4543_v36  ;;  %v4550_v43 = vld [vmem:[%s5378_s24 + $0x40] ss:$28 sps:$4 sm:$0xff]   ;;  %v4553_v46 = vld [vmem:[%s5378_s24 + $0x70] ss:$28 sps:$4 sm:$0xff]   ;;  %v4558_v49 = vld [vmem:[%s5378_s24 + $0x78] ss:$28 sps:$4 sm:$0xff]  }
  0x1d   : > { %3979 = vmatpush3.bf16.msra.mxu1 %v4520_v15  ;;  %v4559_v47 = vld [vmem:[%s5378_s24 + $0xac] ss:$28 sps:$4 sm:$0xff]   ;;  %v4568_v48 = vld [vmem:[%s6043_s1 + $0x150] sm:$0xff]   ;;  %v4565_v53 = vld [vmem:[%s5378_s24 + $0xe4] ss:$28 sps:$4 sm:$0xff]  }
  0x1e   : > { %3980 = vmatprep.subr.bf16.mxu1 %v4523_v18  ;;  %v4571_v50 = vld [vmem:[%s6043_s1 + $0x110] sm:$0xff]   ;;  %v4561_v52 = vld [vmem:[%s5378_s24 + $0xa8] ss:$28 sps:$4 sm:$0xff]   ;;  %v4582_v54 = vld [vmem:[%s6043_s1 + $0x158] sm:$0xff]  }
  0x1f   : > { %3869 = vmatpush3.bf16.msra.mxu0 %v4522_v17  ;;  %v4562_v51 = vld [vmem:[%s5378_s24 + $0xb4] ss:$28 sps:$4 sm:$0xff]   ;;  %v4585_v56 = vld [vmem:[%s6043_s1 + $0x118] sm:$0xff]   ;;  %v4569_v57 = vld [vmem:[%s5378_s24 + $0xec] ss:$28 sps:$4 sm:$0xff]  }
  0x20   : > { %3870 = vmatprep.subr.bf16.mxu0 %v4525_v20  ;;  %v4564_v55 = vld [vmem:[%s5378_s24 + $0xb0] ss:$28 sps:$4 sm:$0xff]   ;;  %v4567_v58 = vld [vmem:[%s5378_s24 + $0xe0] ss:$28 sps:$4 sm:$0xff]   ;;  %v4572_v61 = vld [vmem:[%s5378_s24 + $0xe8] ss:$28 sps:$4 sm:$0xff]  }
  0x21   : > { %3981 = vmatpush3.bf16.msra.mxu1 %v4524_v19  ;;  %v4596_v59 = vld [vmem:[%s6043_s1 + $0x160] sm:$0xff]   ;;  %v4573_v60 = vld [vmem:[%s5378_s24 + $0x11c] ss:$28 sps:$4 sm:$0xff]   ;;  %v4611_v2 = vld [vmem:[%s6043_s1 + $0x168] sm:$0xff]  }
  0x22   : > { %3982 = vmatprep.subr.bf16.mxu1 %v4527_v22  ;;  %v4599_v62 = vld [vmem:[%s6043_s1 + $0x120] sm:$0xff]   ;;  %v4575_v1 = vld [vmem:[%s5378_s24 + $0x118] ss:$28 sps:$4 sm:$0xff]   ;;  %v4614_v4 = vld [vmem:[%s6043_s1 + $0x128] sm:$0xff]  }
  0x23   : > { %3871 = vmatpush3.bf16.msra.mxu0 %v4526_v21  ;;  %v4601_v63 = vld [vmem:[%s6043_s1 + $0x180] sm:$0xff]   ;;  %v4579_v3 = vld [vmem:[%s5378_s24 + $0x154] ss:$28 sps:$4 sm:$0xff]   ;;  %v4583_v6 = vld [vmem:[%s5378_s24 + $0x15c] ss:$28 sps:$4 sm:$0xff]  }
  0x24   : > { %3872 = vmatprep.subr.bf16.mxu0 %v4529_v24  ;;  %v4576_v0 = vld [vmem:[%s5378_s24 + $0x124] ss:$28 sps:$4 sm:$0xff]   ;;  %v4581_v7 = vld [vmem:[%s5378_s24 + $0x150] ss:$28 sps:$4 sm:$0xff]   ;;  %v4586_v11 = vld [vmem:[%s5378_s24 + $0x158] ss:$28 sps:$4 sm:$0xff]  }
  0x25   : > { %3983 = vmatpush3.bf16.msra.mxu1 %v4528_v23  ;;  %v4578_v5 = vld [vmem:[%s5378_s24 + $0x120] ss:$28 sps:$4 sm:$0xff]   ;;  %v4625_v8 = vld [vmem:[%s6043_s1 + $0x170] sm:$0xff]   ;;  %v4587_v9 = vld [vmem:[%s5378_s24 + $0x18c] ss:$28 sps:$4 sm:$0xff]  }
  0x26   : > { %3984 = vmatprep.subr.bf16.mxu1 %v4531_v26  ;;  %v4628_v10 = vld [vmem:[%s6043_s1 + $0x130] sm:$0xff]   ;;  %v4639_v13 = vld [vmem:[%s6043_s1 + $0x178] sm:$0xff]   ;;  %v4589_v14 = vld [vmem:[%s5378_s24 + $0x188] ss:$28 sps:$4 sm:$0xff]  }
  0x27   : > { %3873 = vmatpush3.bf16.msra.mxu0 %v4530_v25  ;;  %v4590_v12 = vld [vmem:[%s5378_s24 + $0x194] ss:$28 sps:$4 sm:$0xff]   ;;  %v4593_v15 = vld [vmem:[%s5378_s24 + $0x1c4] ss:$28 sps:$4 sm:$0xff]   ;;  %v4642_v16 = vld [vmem:[%s6043_s1 + $0x138] sm:$0xff]  }
  0x28   : > { %3874 = vmatprep.subr.bf16.mxu0 %v4533_v28  ;;  %v4592_v17 = vld [vmem:[%s5378_s24 + $0x190] ss:$28 sps:$4 sm:$0xff]   ;;  %v4595_v19 = vld [vmem:[%s5378_s24 + $0x1c0] ss:$28 sps:$4 sm:$0xff]   ;;  %v4600_v21 = vld [vmem:[%s5378_s24 + $0x1c8] ss:$28 sps:$4 sm:$0xff]  }
  0x29   : > { %3985 = vmatpush3.bf16.msra.mxu1 %v4532_v27  ;;  %v4597_v18 = vld [vmem:[%s5378_s24 + $0x1cc] ss:$28 sps:$4 sm:$0xff]   ;;  %v4602_v20 = vld [vmem:[%s5378_s24 + $0x1fc] ss:$28 sps:$4 sm:$0xff]   ;;  %v4605_v22 = vld [vmem:[%s5378_s24 + $0x204] ss:$28 sps:$4 sm:$0xff]  }
  0x2a   : > { %3986 = vmatprep.subr.bf16.mxu1 %v4535_v30  ;;  %v4604_v23 = vld [vmem:[%s5378_s24 + $0x1f8] ss:$28 sps:$4 sm:$0xff]   ;;  %v4607_v25 = vld [vmem:[%s5378_s24 + $0x200] ss:$28 sps:$4 sm:$0xff]   ;;  %v4610_v27 = vld [vmem:[%s5378_s24 + $0x230] ss:$28 sps:$4 sm:$0xff]  }
  0x2b   : > { %3875 = vmatpush3.bf16.msra.mxu0 %v4534_v29  ;;  %v4608_v24 = vld [vmem:[%s5378_s24 + $0x234] ss:$28 sps:$4 sm:$0xff]   ;;  %v4612_v26 = vld [vmem:[%s5378_s24 + $0x23c] ss:$28 sps:$4 sm:$0xff]   ;;  %v4616_v28 = vld [vmem:[%s5378_s24 + $0x26c] ss:$28 sps:$4 sm:$0xff]  }
  0x2c   : > { %4084 = vmatprep.subr.bf16.mxu0 %v4540_v34  ;;  %v4615_v29 = vld [vmem:[%s5378_s24 + $0x238] ss:$28 sps:$4 sm:$0xff]   ;;  %v4622_v32 = vld [vmem:[%s5378_s24 + $0x2a4] ss:$28 sps:$4 sm:$0xff]   ;;  %v4626_v34 = vld [vmem:[%s5378_s24 + $0x2ac] ss:$28 sps:$4 sm:$0xff]  }
  0x2d   : > { %3987 = vmatpush3.bf16.msra.mxu1 %v4539_v33  ;;  %v4619_v30 = vld [vmem:[%s5378_s24 + $0x274] ss:$28 sps:$4 sm:$0xff]   ;;  %v4630_v36 = vld [vmem:[%s5378_s24 + $0x2dc] ss:$28 sps:$4 sm:$0xff]  }
  0x2e   : > { %1507 = vmatmul.mubr.bf16.vlgmr.msra.gmra.mrb[0].mxu0 %v4536_v31  ;;  %4285 = vmatprep.subr.bf16.mxu1 %v4601_v63  ;;  %v4618_v31 = vld [vmem:[%s5378_s24 + $0x268] ss:$28 sps:$4 sm:$0xff]   ;;  %v4621_v33 = vld [vmem:[%s5378_s24 + $0x270] ss:$28 sps:$4 sm:$0xff]  }
  0x2f   : > { %4085 = vmatpush3.bf16.msra.mxu0 %v4544_v37  ;;  %1514 = vmatprep.mubr.bf16.mxu0 %v4545_v38  ;;  %v4629_v37 = vld [vmem:[%s5378_s24 + $0x2a8] ss:$28 sps:$4 sm:$0xff]  }
  0x30   : > { %1668 = vmatmul.mubr.bf16.vlgmr.msra.gmra.mrb[0].mxu1 %v4541_v35  ;;  %4086 = vmatprep.subr.bf16.mxu0 %v4554_v42  ;;  %v4624_v35 = vld [vmem:[%s5378_s24 + $0x2a0] ss:$28 sps:$4 sm:$0xff]  }
  0x31   : > { %1675 = vmatprep.mubr.bf16.mxu1 %v4548_v39  ;;  %4286 = vmatpush3.bf16.msra.mxu1 %v4601_v63  ;;  %v4633_v38 = vld [vmem:[%s5378_s24 + $0x2e4] ss:$28 sps:$4 sm:$0xff]   ;;  %v4632_v39 = vld [vmem:[%s5378_s24 + $0x2d8] ss:$28 sps:$4 sm:$0xff]  }
  0x32   : > { %v4640_v42 = vld [vmem:[%s5378_s24 + $0x31c] ss:$28 sps:$4 sm:$0xff]  }
  0x33   : > { %4087 = vmatpush3.bf16.msra.mxu0 %v4557_v45  ;;  %v4643_v45 = vld [vmem:[%s5378_s24 + $0x318] ss:$28 sps:$4 sm:$0xff]  }
  0x34   : > { %4088 = vmatprep.subr.bf16.mxu0 %v4568_v48  ;;  %v4652_v48 = vld [vmem:[%s5378_s24 + $0x14] ss:$28 sps:$4 sm:$0xff]  }
  0x35   : > { %v4665_v63 = vld [vmem:[%s5378_s24 + $0xb8] ss:$28 sps:$4 sm:$0xff]  }
  0x36   : > { %1515 = vmatmul.mubr.bf16.gmra.mrb[4].mxu0 %v4547_v40  ;;  %v4636_v40 = vld [vmem:[%s5378_s24 + $0x314] ss:$28 sps:$4 sm:$0xff]  }
  0x37   : > { %1522 = vmatprep.mubr.bf16.mxu0 %v4551_v41  ;;  %4089 = vmatpush3.bf16.msra.mxu0 %v4571_v50  ;;  %v4635_v41 = vld [vmem:[%s5378_s24 + $0x2e0] ss:$28 sps:$4 sm:$0xff]   ;;  %v4653_v50 = vld [vmem:[%s5378_s24 + $0x18] ss:$28 sps:$4 sm:$0xff]  }
  0x38   : > { %1676 = vmatmul.mubr.bf16.gmra.mrb[4].mxu1 %v4550_v43  ;;  %4090 = vmatprep.subr.bf16.mxu0 %v4582_v54  ;;  %v4638_v43 = vld [vmem:[%s5378_s24 + $0x310] ss:$28 sps:$4 sm:$0xff]   ;;  %v4661_v54 = vld [vmem:[%s5378_s24 + $0x88] ss:$28 sps:$4 sm:$0xff]  }
  0x39   : > { %1683 = vmatprep.mubr.bf16.mxu1 %v4555_v44  ;;  %v4644_v44 = vld [vmem:[%s5378_s24 + $0x34c] ss:$28 sps:$4 sm:$0xff]  }
  0x3b   : > { %4091 = vmatpush3.bf16.msra.mxu0 %v4585_v56  ;;  %v4658_v56 = vld [vmem:[%s5378_s24 + $0x84] ss:$28 sps:$4 sm:$0xff]  }
  0x3c   : > { %4092 = vmatprep.subr.bf16.mxu0 %v4596_v59  ;;  %v4660_v59 = vld [vmem:[%s5378_s24 + $0x80] ss:$28 sps:$4 sm:$0xff]  }
  0x3e   : > { %1523 = vmatmul.mubr.bf16.gmra.mrb[8].mxu0 %v4553_v46  ;;  %v4647_v46 = vld [vmem:[%s5378_s24 + $0x354] ss:$28 sps:$4 sm:$0xff]  }
  0x3f   : > { %1530 = vmatprep.mubr.bf16.mxu0 %v4559_v47  ;;  %4093 = vmatpush3.bf16.msra.mxu0 %v4599_v62  ;;  %v4646_v47 = vld [vmem:[%s5378_s24 + $0x348] ss:$28 sps:$4 sm:$0xff]  }
  0x40   : > { %1684 = vmatmul.mubr.bf16.gmra.mrb[8].mxu1 %v4558_v49  ;;  %4094 = vmatprep.subr.bf16.mxu0 %v4611_v2  ;;  %v4649_v49 = vld [vmem:[%s5378_s24 + $0x350] ss:$28 sps:$4 sm:$0xff]   ;;  %v4677_v62 = vld [vmem:[%s5378_s24 + $0x168] ss:$28 sps:$4 sm:$0xff]   ;;  %v4685_v2 = vld [vmem:[%s5378_s24 + $0x1d8] ss:$28 sps:$4 sm:$0xff]  }
  0x41   : > { %1691 = vmatprep.mubr.bf16.mxu1 %v4562_v51  ;;  %v4650_v51 = vld [vmem:[%s5378_s24 + $0x10] ss:$28 sps:$4 sm:$0xff]  }
  0x43   : > { %4095 = vmatpush3.bf16.msra.mxu0 %v4614_v4  ;;  %v4671_v4 = vld [vmem:[%s5378_s24 + $0x12c] ss:$28 sps:$4 sm:$0xff]  }
  0x44   : > { %4096 = vmatprep.subr.bf16.mxu0 %v4625_v8  ;;  %v4674_v8 = vld [vmem:[%s5378_s24 + $0x164] ss:$28 sps:$4 sm:$0xff]  }
  0x46   : > { %1531 = vmatmul.mubr.bf16.gmra.mrb[12].mxu0 %v4561_v52  ;;  %v4655_v52 = vld [vmem:[%s5378_s24 + $0x4c] ss:$28 sps:$4 sm:$0xff]  }
  0x47   : > { %1538 = vmatprep.mubr.bf16.mxu0 %v4565_v53  ;;  %4097 = vmatpush3.bf16.msra.mxu0 %v4628_v10  ;;  %v4654_v53 = vld [vmem:[%s5378_s24 + $0x50] ss:$28 sps:$4 sm:$0xff]   ;;  %v4701_v10 = vld [vmem:[%s5378_s24 + $0x2b8] ss:$28 sps:$4 sm:$0xff]  }
  0x48   : > { %1692 = vmatmul.mubr.bf16.gmra.mrb[12].mxu1 %v4564_v55  ;;  %4098 = vmatprep.subr.bf16.mxu0 %v4639_v13  ;;  %v4657_v55 = vld [vmem:[%s5378_s24 + $0x48] ss:$28 sps:$4 sm:$0xff]   ;;  %v4702_v13 = vld [vmem:[%s5378_s24 + $0x2f0] ss:$28 sps:$4 sm:$0xff]  }
  0x49   : > { %1699 = vmatprep.mubr.bf16.mxu1 %v4569_v57  ;;  %v4662_v57 = vld [vmem:[%s5378_s24 + $0xc0] ss:$28 sps:$4 sm:$0xff]  }
  0x4b   : > { %4099 = vmatpush3.bf16.msra.mxu0 %v4642_v16  ;;  %v4682_v16 = vld [vmem:[%s5378_s24 + $0x1d4] ss:$28 sps:$4 sm:$0xff]  }
  0x4e   : > { %1539 = vmatmul.mubr.bf16.gmra.mrb[16].mxu0 %v4567_v58  ;;  %v4669_v58 = vld [vmem:[%s5378_s24 + $0xf8] ss:$28 sps:$4 sm:$0xff]  }
  0x4f   : > { %1546 = vmatprep.mubr.bf16.mxu0 %v4573_v60  ;;  %v4663_v60 = vld [vmem:[%s5378_s24 + $0xbc] ss:$28 sps:$4 sm:$0xff]  }
  0x50   : > { %1700 = vmatmul.mubr.bf16.gmra.mrb[16].mxu1 %v4572_v61  ;;  %v4670_v61 = vld [vmem:[%s5378_s24 + $0x130] ss:$28 sps:$4 sm:$0xff]  }
  0x51   : > { %1707 = vmatprep.mubr.bf16.mxu1 %v4576_v0  ;;  %v4666_v0 = vld [vmem:[%s5378_s24 + $0xf4] ss:$28 sps:$4 sm:$0xff]  }
  0x56   : > { %1547 = vmatmul.mubr.bf16.gmra.mrb[20].mxu0 %v4575_v1  ;;  %v4678_v1 = vld [vmem:[%s5378_s24 + $0x1a0] ss:$28 sps:$4 sm:$0xff]  }
  0x57   : > { %1554 = vmatprep.mubr.bf16.mxu0 %v4579_v3  ;;  %v4668_v3 = vld [vmem:[%s5378_s24 + $0xf0] ss:$28 sps:$4 sm:$0xff]  }
  0x58   : > { %1708 = vmatmul.mubr.bf16.gmra.mrb[20].mxu1 %v4578_v5  ;;  %v4686_v5 = vld [vmem:[%s5378_s24 + $0x210] ss:$28 sps:$4 sm:$0xff]  }
  0x59   : > { %1715 = vmatprep.mubr.bf16.mxu1 %v4583_v6  ;;  %v4693_v6 = vld [vmem:[%s5378_s24 + $0x248] ss:$28 sps:$4 sm:$0xff]  }
  0x5e   : > { %1555 = vmatmul.mubr.bf16.gmra.mrb[24].mxu0 %v4581_v7  ;;  %v4673_v7 = vld [vmem:[%s5378_s24 + $0x128] ss:$28 sps:$4 sm:$0xff]  }
  0x5f   : > { %1562 = vmatprep.mubr.bf16.mxu0 %v4587_v9  ;;  %v4694_v9 = vld [vmem:[%s5378_s24 + $0x280] ss:$28 sps:$4 sm:$0xff]  }
  0x60   : > { %1716 = vmatmul.mubr.bf16.gmra.mrb[24].mxu1 %v4586_v11  ;;  %v4676_v11 = vld [vmem:[%s5378_s24 + $0x160] ss:$28 sps:$4 sm:$0xff]  }
  0x61   : > { %1723 = vmatprep.mubr.bf16.mxu1 %v4590_v12  ;;  %v4679_v12 = vld [vmem:[%s5378_s24 + $0x19c] ss:$28 sps:$4 sm:$0xff]  }
  0x66   : > { %1563 = vmatmul.mubr.bf16.gmra.mrb[28].mxu0 %v4589_v14  ;;  %v4709_v14 = vld [vmem:[%s5378_s24 + $0x328] ss:$28 sps:$4 sm:$0xff]  }
  0x67   : > { %1570 = vmatprep.mubr.bf16.mxu0 %v4593_v15  ;;  %v4681_v15 = vld [vmem:[%s5378_s24 + $0x198] ss:$28 sps:$4 sm:$0xff]  }
  0x68   : > { %1724 = vmatmul.mubr.bf16.gmra.mrb[28].mxu1 %v4592_v17  ;;  %v4710_v17 = vld [vmem:[%s5378_s24 + $0x360] ss:$28 sps:$4 sm:$0xff]  }
  0x69   : > { %1731 = vmatprep.mubr.bf16.mxu1 %v4597_v18  ;;  %v4684_v18 = vld [vmem:[%s5378_s24 + $0x1d0] ss:$28 sps:$4 sm:$0xff]  }
  0x6e   : > { %1571 = vmatmul.mubr.bf16.gmra.mrb[32].mxu0 %v4595_v19  ;;  %v4687_v19 = vld [vmem:[%s5378_s24 + $0x20c] ss:$28 sps:$4 sm:$0xff]  }
  0x6f   : > { %1578 = vmatprep.mubr.bf16.mxu0 %v4602_v20  ;;  %v4689_v20 = vld [vmem:[%s5378_s24 + $0x208] ss:$28 sps:$4 sm:$0xff]  }
  0x70   : > { %1732 = vmatmul.mubr.bf16.gmra.mrb[32].mxu1 %v4600_v21  ;;  %v4690_v21 = vld [vmem:[%s5378_s24 + $0x244] ss:$28 sps:$4 sm:$0xff]  }
  0x71   : > { %1739 = vmatprep.mubr.bf16.mxu1 %v4605_v22  ;;  %v4692_v22 = vld [vmem:[%s5378_s24 + $0x240] ss:$28 sps:$4 sm:$0xff]  }
  0x76   : > { %1579 = vmatmul.mubr.bf16.gmra.mrb[36].mxu0 %v4604_v23  ;;  %v4695_v23 = vld [vmem:[%s5378_s24 + $0x27c] ss:$28 sps:$4 sm:$0xff]  }
  0x77   : > { %1586 = vmatprep.mubr.bf16.mxu0 %v4608_v24 }
  0x78   : > { %1740 = vmatmul.mubr.bf16.gmra.mrb[36].mxu1 %v4607_v25  ;;  %v5562_v25 = vld [vmem:[%s6044_s2] ss:$0 sm:$0xff] }
  0x79   : > { %1747 = vmatprep.mubr.bf16.mxu1 %v4612_v26 }
  0x7e   : > { %1587 = vmatmul.mubr.bf16.gmra.mrb[40].mxu0 %v4610_v27  ;;  %v4697_v27 = vld [vmem:[%s5378_s24 + $0x278] ss:$28 sps:$4 sm:$0xff]  }
  0x7f   : > { %1594 = vmatprep.mubr.bf16.mxu0 %v4616_v28 }
  0x80   : > { %1748 = vmatmul.mubr.bf16.gmra.mrb[40].mxu1 %v4615_v29 }
  0x81   : > { %1755 = vmatprep.mubr.bf16.mxu1 %v4619_v30  ;;  %v4698_v30 = vld [vmem:[%s5378_s24 + $0x2b4] ss:$28 sps:$4 sm:$0xff]  }
  0x86   : > { %1595 = vmatmul.mubr.bf16.gmra.mrb[44].mxu0 %v4618_v31 }
  0x87   : > { %1602 = vmatprep.mubr.bf16.mxu0 %v4622_v32 }
  0x88   : > { %1756 = vmatmul.mubr.bf16.gmra.mrb[44].mxu1 %v4621_v33 }
  0x89   : > { %1763 = vmatprep.mubr.bf16.mxu1 %v4626_v34 }
  0x8e   : > { %1603 = vmatmul.mubr.bf16.gmra.mrb[48].mxu0 %v4624_v35 }
  0x8f   : > { %1610 = vmatprep.mubr.bf16.mxu0 %v4630_v36 }
  0x90   : > { %1764 = vmatmul.mubr.bf16.gmra.mrb[48].mxu1 %v4629_v37 }
  0x91   : > { %1771 = vmatprep.mubr.bf16.mxu1 %v4633_v38 }
  0x96   : > { %1611 = vmatmul.mubr.bf16.gmra.mrb[52].mxu0 %v4632_v39 }
  0x97   : > { %1618 = vmatprep.mubr.bf16.mxu0 %v4636_v40 }
  0x98   : > { %1772 = vmatmul.mubr.bf16.gmra.mrb[52].mxu1 %v4635_v41 }
  0x99   : > { %1779 = vmatprep.mubr.bf16.mxu1 %v4640_v42 }
  0x9e   : > { %1619 = vmatmul.mubr.bf16.gmra.mrb[56].mxu0 %v4638_v43 }
  0x9f   : > { %1626 = vmatprep.mubr.bf16.mxu0 %v4644_v44 }
  0xa0   : > { %1780 = vmatmul.mubr.bf16.gmra.mrb[56].mxu1 %v4643_v45  ;;  %v4700_v45 = vld [vmem:[%s5378_s24 + $0x2b0] ss:$28 sps:$4 sm:$0xff]  }
  0xa1   : > { %1787 = vmatprep.mubr.bf16.mxu1 %v4647_v46 }
  0xa6   : > { %1627 = vmatmul.mubr.bf16.gmra.mrb[60].mxu0 %v4646_v47 }
  0xa7   : > { %1828 = vmatprep.mubr.bf16.mxu0 %v4652_v48  ;;  %v4703_v48 = vld [vmem:[%s5378_s24 + $0x2ec] ss:$28 sps:$4 sm:$0xff]  }
  0xa8   : > { %1788 = vmatmul.mubr.bf16.gmra.mrb[60].mxu1 %v4649_v49 }
  0xa9   : > { %4287 = vmatprep.mubr.msk.bf16.mxu1 %vm1425_vm0, %v4653_v50 }
  0xae   : > { %1829 = vmatmul.mubr.bf16.vlgmr.msra.gmra.mrb[64].mxu0 %v4650_v51 }
  0xaf   : > { %1836 = vmatprep.mubr.bf16.mxu0 %v4655_v52 }
  0xb0   : > { %4288 = vmatmul.mubr.msk.bf16.vlgmr.msra.gmra.mrb[64].mxu1 %vm1425_vm0, %v4654_v53 }
  0xb1   : > { %4291 = vmatprep.mubr.msk.bf16.mxu1 %vm1425_vm0, %v4661_v54 }
  0xb6   : > { %1837 = vmatmul.mubr.bf16.gmra.mrb[68].mxu0 %v4657_v55 }
  0xb7   : > { %1844 = vmatprep.mubr.bf16.mxu0 %v4658_v56  ;;  %v4714_v56 = vld [vmem:[%s6045_s3] sm:$0xff]  }
  0xb8   : > { %4292 = vmatmul.mubr.msk.bf16.gmra.mrb[68].mxu1 %vm1425_vm0, %v4662_v57  ;;  %4319 = vmatprep.subr.bf16.mxu1 %v4714_v56 }
  0xb9   : > { %4295 = vmatprep.mubr.msk.bf16.mxu1 %vm1425_vm0, %v4669_v58  ;;  %4320 = vmatpush3.bf16.msra.mxu1 %v4714_v56 }
  0xbe   : > { %1845 = vmatmul.mubr.bf16.gmra.mrb[72].mxu0 %v4660_v59 }
  0xbf   : > { %1852 = vmatprep.mubr.bf16.mxu0 %v4663_v60 }
  0xc0   : > { %4296 = vmatmul.mubr.msk.bf16.gmra.mrb[72].mxu1 %vm1425_vm0, %v4670_v61 }
  0xc1   : > { %4299 = vmatprep.mubr.msk.bf16.mxu1 %vm1425_vm0, %v4677_v62 }
  0xc6   : > { %1853 = vmatmul.mubr.bf16.gmra.mrb[76].mxu0 %v4665_v63 }
  0xc7   : > { %1860 = vmatprep.mubr.bf16.mxu0 %v4666_v0  ;;  %v4705_v0 = vld [vmem:[%s5378_s24 + $0x2e8] ss:$28 sps:$4 sm:$0xff]  }
  0xc8   : > { %4300 = vmatmul.mubr.msk.bf16.gmra.mrb[76].mxu1 %vm1425_vm0, %v4678_v1  ;;  %v4715_v1 = vld [vmem:[%s6045_s3 + $0x8] sm:$0xff]  }
  0xc9   : > { %4303 = vmatprep.mubr.msk.bf16.mxu1 %vm1425_vm0, %v4685_v2  ;;  %4321 = vmatprep.subr.bf16.mxu1 %v4715_v1 }
  0xca   : > { %4322 = vmatpush3.bf16.msra.mxu1 %v4715_v1 }
  0xce   : > { %1861 = vmatmul.mubr.bf16.gmra.mrb[80].mxu0 %v4668_v3 }
  0xcf   : > { %1868 = vmatprep.mubr.bf16.mxu0 %v4671_v4  ;;  %v4706_v4 = vld [vmem:[%s5378_s24 + $0x324] ss:$28 sps:$4 sm:$0xff]  }
  0xd0   : > { %4304 = vmatmul.mubr.msk.bf16.gmra.mrb[80].mxu1 %vm1425_vm0, %v4686_v5 }
  0xd1   : > { %4307 = vmatprep.mubr.msk.bf16.mxu1 %vm1425_vm0, %v4693_v6 }
  0xd6   : > { %1869 = vmatmul.mubr.bf16.gmra.mrb[84].mxu0 %v4673_v7 }
  0xd7   : > { %1876 = vmatprep.mubr.bf16.mxu0 %v4674_v8 }
  0xd8   : > { %4308 = vmatmul.mubr.msk.bf16.gmra.mrb[84].mxu1 %vm1425_vm0, %v4694_v9 }
  0xd9   : > { %4311 = vmatprep.mubr.msk.bf16.mxu1 %vm1425_vm0, %v4701_v10 }
  0xde   : > { %1877 = vmatmul.mubr.bf16.gmra.mrb[88].mxu0 %v4676_v11 }
  0xdf   : > { %1884 = vmatprep.mubr.bf16.mxu0 %v4679_v12  ;;  %v4716_v12 = vld [vmem:[%s6045_s3 + $0x10] sm:$0xff]  }
  0xe0   : > { %4312 = vmatmul.mubr.msk.bf16.gmra.mrb[88].mxu1 %vm1425_vm0, %v4702_v13  ;;  %4323 = vmatprep.subr.bf16.mxu1 %v4716_v12 }
  0xe1   : > { %4315 = vmatprep.mubr.msk.bf16.mxu1 %vm1425_vm0, %v4709_v14  ;;  %4324 = vmatpush3.bf16.msra.mxu1 %v4716_v12 }
  0xe6   : > { %1885 = vmatmul.mubr.bf16.gmra.mrb[92].mxu0 %v4681_v15 }
  0xe7   : > { %1892 = vmatprep.mubr.bf16.mxu0 %v4682_v16 }
  0xe8   : > { %4316 = vmatmul.mubr.msk.bf16.gmra.mrb[92].mxu1 %vm1425_vm0, %v4710_v17 }
  0xee   : > { %1893 = vmatmul.mubr.bf16.gmra.mrb[96].mxu0 %v4684_v18 }
  0xef   : > { %1900 = vmatprep.mubr.bf16.mxu0 %v4687_v19 }
  0xf6   : > { %1901 = vmatmul.mubr.bf16.gmra.mrb[100].mxu0 %v4689_v20  ;;  %v4708_v20 = vld [vmem:[%s5378_s24 + $0x320] ss:$28 sps:$4 sm:$0xff]  }
  0xf7   : > { %1908 = vmatprep.mubr.bf16.mxu0 %v4690_v21  ;;  %v4717_v21 = vld [vmem:[%s6045_s3 + $0x18] sm:$0xff]  }
  0xf8   : > { %4325 = vmatprep.subr.bf16.mxu1 %v4717_v21 }
  0xf9   : > { %4326 = vmatpush3.bf16.msra.mxu1 %v4717_v21 }
  0xfe   : > { %1909 = vmatmul.mubr.bf16.gmra.mrb[104].mxu0 %v4692_v22 }
  0xff   : > { %1916 = vmatprep.mubr.bf16.mxu0 %v4695_v23 }
 0x101   : > { %v3876_v24 = vpop.f32.mrb[0].mxu0 }
 0x102   : > { %v3877_v26 = vpop.f32.mrb[1].mxu0 }
 0x103   : > { %v3878_v28 = vadd.f32 %v3877_v26, %v3876_v24  ;;  %v3879_v29 = vpop.f32.mrb[2].mxu0  ;;  %v3988_v31 = vpop.f32.mrb[0].mxu1  ;;  %v4711_v24 = vld [vmem:[%s5378_s24 + $0x35c] ss:$28 sps:$4 sm:$0xff]  }
 0x104   : > { %v3880_v32 = vpop.f32.mrb[3].mxu0  ;;  %v3989_v35 = vpop.f32.mrb[1].mxu1 }
 0x105   : > { %v1509_v33 = vadd.f32 %v3878_v28, %v5562_v25  ;;  %v3881_v34 = vadd.f32 %v3880_v32, %v3879_v29  ;;  %v3990_v36 = vadd.f32 %v3989_v35, %v3988_v31  ;;  %v3991_v37 = vpop.f32.mrb[2].mxu1 }
 0x106   : > { %1917 = vmatmul.mubr.bf16.gmra.mrb[108].mxu0 %v4697_v27  ;;  %v3992_v39 = vpop.f32.mrb[3].mxu1 }
 0x107   : > { %v1512_v38 = vadd.f32 %v3881_v34, %v5562_v25  ;;  %1924 = vmatprep.mubr.bf16.mxu0 %v4698_v30  ;;  %v5568_v40 = vadd.f32 %v3990_v36, %v1509_v33  ;;  %v3993_v41 = vadd.f32 %v3992_v39, %v3991_v37  ;;  %v4718_v33 = vld [vmem:[%s6045_s3 + $0x20] sm:$0xff]  }
 0x108   : > { %4327 = vmatprep.subr.bf16.mxu1 %v4718_v33 }
 0x109   : > { %v3882_v42 = vpop.f32.mrb[4].mxu0  ;;  %v5570_v43 = vadd.f32 %v3993_v41, %v1512_v38  ;;  %4328 = vmatpush3.bf16.msra.mxu1 %v4718_v33 }
 0x10a   : > { %v3883_v44 = vpop.f32.mrb[5].mxu0 }
 0x10b   : > { %v3884_v46 = vadd.f32 %v3883_v44, %v3882_v42  ;;  %v3885_v47 = vpop.f32.mrb[6].mxu0  ;;  %v3994_v49 = vpop.f32.mrb[4].mxu1  ;;  %v4713_v42 = vld [vmem:[%s5378_s24 + $0x358] ss:$28 sps:$4 sm:$0xff]   ;;  %v4719_v44 = vld [vmem:[%s6045_s3 + $0x28] sm:$0xff]   ;;  %s5122_s24 = scalar_lea.vmem %s5993_s22, 4096 }
 0x10c   : > { %v3886_v50 = vpop.f32.mrb[7].mxu0  ;;  %v3995_v53 = vpop.f32.mrb[5].mxu1  ;;  %4329 = vmatprep.subr.bf16.mxu1 %v4719_v44  ;;  %p5123_p11 = scmp.ne.s32.totalorder %s5993_s22, %s5122_s24  ;;  %p5130_p1 = scmp.lt.s32.totalorder %s5128_s26, %s5122_s24 }
 0x10d   : > { %v1517_v51 = vadd.f32 %v3884_v46, %v5562_v25  ;;  %v3887_v52 = vadd.f32 %v3886_v50, %v3885_v47  ;;  %v3996_v54 = vadd.f32 %v3995_v53, %v3994_v49  ;;  %v3997_v55 = vpop.f32.mrb[6].mxu1  ;;  %4330 = vmatpush3.bf16.msra.mxu1 %v4719_v44 }
 0x10e   : > { %1925 = vmatmul.mubr.bf16.gmra.mrb[112].mxu0 %v4700_v45  ;;  %v3998_v58 = vpop.f32.mrb[7].mxu1  ;;  %p5124_p12 = pnand %p5123_p11, %p5277_p5  ;;  %p5131_p2 = por %p5130_p1, %p5129_p0 }
 0x10f   : > { %v1520_v57 = vadd.f32 %v3887_v52, %v5562_v25  ;;  %1932 = vmatprep.mubr.bf16.mxu0 %v4703_v48  ;;  %v5579_v59 = vadd.f32 %v3996_v54, %v1517_v51  ;;  %v3999_v60 = vadd.f32 %v3998_v58, %v3997_v55  ;;  %v4720_v54 = vld [vmem:[%s6045_s3 + $0x30] sm:$0xff]  }
 0x110   : > { %4331 = vmatprep.subr.bf16.mxu1 %v4720_v54  ;;  %p5125_p13 = pneg %p5124_p12 }
 0x111   : > { %v3888_v61 = vpop.f32.mrb[8].mxu0  ;;  %v5581_v62 = vadd.f32 %v3999_v60, %v1520_v57  ;;  %4332 = vmatpush3.bf16.msra.mxu1 %v4720_v54 }
 0x112   : > { %v3889_v63 = vpop.f32.mrb[9].mxu0  ;;  %p5132_p3 = pnand %p5131_p2, %p5125_p13 }
 0x113   : > { %v3890_v2 = vadd.f32 %v3889_v63, %v3888_v61  ;;  %v3891_v3 = vpop.f32.mrb[10].mxu0  ;;  %v4000_v5 = vpop.f32.mrb[8].mxu1 }
 0x114   : > { %v3892_v6 = vpop.f32.mrb[11].mxu0  ;;  %v4001_v9 = vpop.f32.mrb[9].mxu1 }
 0x115   : > { %v1525_v7 = vadd.f32 %v3890_v2, %v5562_v25  ;;  %v3893_v8 = vadd.f32 %v3892_v6, %v3891_v3  ;;  %v4002_v10 = vadd.f32 %v4001_v9, %v4000_v5  ;;  %v4003_v11 = vpop.f32.mrb[10].mxu1 }
 0x116   : > { %1933 = vmatmul.mubr.bf16.gmra.mrb[116].mxu0 %v4705_v0  ;;  %v4004_v14 = vpop.f32.mrb[11].mxu1  ;;  %v4721_v0 = vld [vmem:[%s6045_s3 + $0x38] sm:$0xff]  }
 0x117   : > { %v1528_v13 = vadd.f32 %v3893_v8, %v5562_v25  ;;  %1940 = vmatprep.mubr.bf16.mxu0 %v4706_v4  ;;  %v5593_v15 = vadd.f32 %v4002_v10, %v1525_v7  ;;  %v4005_v16 = vadd.f32 %v4004_v14, %v4003_v11  ;;  %4333 = vmatprep.subr.bf16.mxu1 %v4721_v0 }
 0x118   : > { %4334 = vmatpush3.bf16.msra.mxu1 %v4721_v0 }
 0x119   : > { %v3894_v17 = vpop.f32.mrb[12].mxu0  ;;  %v5595_v18 = vadd.f32 %v4005_v16, %v1528_v13 }
 0x11a   : > { %v3895_v19 = vpop.f32.mrb[13].mxu0 }
 0x11b   : > { %v3896_v22 = vadd.f32 %v3895_v19, %v3894_v17  ;;  %v3897_v23 = vpop.f32.mrb[14].mxu0  ;;  %v4006_v26 = vpop.f32.mrb[12].mxu1 }
 0x11c   : > { %v3898_v27 = vpop.f32.mrb[15].mxu0  ;;  %v4007_v30 = vpop.f32.mrb[13].mxu1 }
 0x11d   : > { %v1533_v28 = vadd.f32 %v3896_v22, %v5562_v25  ;;  %v3899_v29 = vadd.f32 %v3898_v27, %v3897_v23  ;;  %v4008_v31 = vadd.f32 %v4007_v30, %v4006_v26  ;;  %v4009_v32 = vpop.f32.mrb[14].mxu1 }
 0x11e   : > { %1941 = vmatmul.mubr.bf16.gmra.mrb[120].mxu0 %v4708_v20  ;;  %v4010_v35 = vpop.f32.mrb[15].mxu1 }
 0x11f   : > { %v1536_v34 = vadd.f32 %v3899_v29, %v5562_v25  ;;  %1948 = vmatprep.mubr.bf16.mxu0 %v4711_v24  ;;  %v5607_v36 = vadd.f32 %v4008_v31, %v1533_v28  ;;  %v4011_v37 = vadd.f32 %v4010_v35, %v4009_v32 }
 0x121   : > { %v3900_v38 = vpop.f32.mrb[16].mxu0  ;;  %v5609_v39 = vadd.f32 %v4011_v37, %v1536_v34 }
 0x122   : > { %v3901_v41 = vpop.f32.mrb[17].mxu0 }
 0x123   : > { %v3902_v45 = vadd.f32 %v3901_v41, %v3900_v38  ;;  %v3903_v46 = vpop.f32.mrb[18].mxu0  ;;  %v4012_v47 = vpop.f32.mrb[16].mxu1 }
 0x124   : > { %v3904_v48 = vpop.f32.mrb[19].mxu0  ;;  %v4013_v51 = vpop.f32.mrb[17].mxu1 }
 0x125   : > { %v1541_v49 = vadd.f32 %v3902_v45, %v5562_v25  ;;  %v3905_v50 = vadd.f32 %v3904_v48, %v3903_v46  ;;  %v4014_v52 = vadd.f32 %v4013_v51, %v4012_v47  ;;  %v4015_v53 = vpop.f32.mrb[18].mxu1 }
 0x126   : > { %1949 = vmatmul.mubr.bf16.gmra.mrb[124].mxu0 %v4713_v42  ;;  %v4016_v56 = vpop.f32.mrb[19].mxu1 }
 0x127   : > { %v1544_v55 = vadd.f32 %v3905_v50, %v5562_v25  ;;  %v5620_v57 = vadd.f32 %v4014_v52, %v1541_v49  ;;  %v4017_v58 = vadd.f32 %v4016_v56, %v4015_v53 }
 0x129   : > { %v3906_v60 = vpop.f32.mrb[20].mxu0  ;;  %v5622_v61 = vadd.f32 %v4017_v58, %v1544_v55 }
 0x12a   : > { %v3907_v63 = vpop.f32.mrb[21].mxu0 }
 0x12b   : > { %v3908_v1 = vadd.f32 %v3907_v63, %v3906_v60  ;;  %v3909_v2 = vpop.f32.mrb[22].mxu0  ;;  %v4018_v3 = vpop.f32.mrb[20].mxu1 }
 0x12c   : > { %v3910_v4 = vpop.f32.mrb[23].mxu0  ;;  %v4019_v7 = vpop.f32.mrb[21].mxu1 }
 0x12d   : > { %v1549_v5 = vadd.f32 %v3908_v1, %v5562_v25  ;;  %v3911_v6 = vadd.f32 %v3910_v4, %v3909_v2  ;;  %v4020_v8 = vadd.f32 %v4019_v7, %v4018_v3  ;;  %v4021_v9 = vpop.f32.mrb[22].mxu1 }
 0x12e   : > { %v4022_v11 = vpop.f32.mrb[23].mxu1 }
 0x12f   : > { %v1552_v10 = vadd.f32 %v3911_v6, %v5562_v25  ;;  %v5629_v12 = vadd.f32 %v4020_v8, %v1549_v5  ;;  %v4023_v13 = vadd.f32 %v4022_v11, %v4021_v9 }
 0x131   : > { %v3912_v14 = vpop.f32.mrb[24].mxu0  ;;  %v5631_v16 = vadd.f32 %v4023_v13, %v1552_v10 }
 0x132   : > { %v3913_v17 = vpop.f32.mrb[25].mxu0 }
 0x133   : > { %v3914_v19 = vadd.f32 %v3913_v17, %v3912_v14  ;;  %v3915_v20 = vpop.f32.mrb[26].mxu0  ;;  %v4024_v21 = vpop.f32.mrb[24].mxu1 }
 0x134   : > { %v3916_v22 = vpop.f32.mrb[27].mxu0  ;;  %v4025_v26 = vpop.f32.mrb[25].mxu1 }
 0x135   : > { %v1557_v23 = vadd.f32 %v3914_v19, %v5562_v25  ;;  %v3917_v24 = vadd.f32 %v3916_v22, %v3915_v20  ;;  %v4026_v27 = vadd.f32 %v4025_v26, %v4024_v21  ;;  %v4027_v28 = vpop.f32.mrb[26].mxu1 }
 0x136   : > { %v4028_v30 = vpop.f32.mrb[27].mxu1 }
 0x137   : > { %v1560_v29 = vadd.f32 %v3917_v24, %v5562_v25  ;;  %v5635_v31 = vadd.f32 %v4026_v27, %v1557_v23  ;;  %v4029_v32 = vadd.f32 %v4028_v30, %v4027_v28 }
 0x139   : > { %v3918_v33 = vpop.f32.mrb[28].mxu0  ;;  %v5637_v34 = vadd.f32 %v4029_v32, %v1560_v29 }
 0x13a   : > { %v3919_v35 = vpop.f32.mrb[29].mxu0 }
 0x13b   : > { %v3920_v37 = vadd.f32 %v3919_v35, %v3918_v33  ;;  %v3921_v38 = vpop.f32.mrb[30].mxu0  ;;  %v4030_v41 = vpop.f32.mrb[28].mxu1 }
 0x13c   : > { %v3922_v42 = vpop.f32.mrb[31].mxu0  ;;  %v4031_v46 = vpop.f32.mrb[29].mxu1 }
 0x13d   : > { %v1565_v44 = vadd.f32 %v3920_v37, %v5562_v25  ;;  %v3923_v45 = vadd.f32 %v3922_v42, %v3921_v38  ;;  %v4032_v47 = vadd.f32 %v4031_v46, %v4030_v41  ;;  %v4033_v48 = vpop.f32.mrb[30].mxu1 }
 0x13e   : > { %v4034_v50 = vpop.f32.mrb[31].mxu1 }
 0x13f   : > { %v1568_v49 = vadd.f32 %v3923_v45, %v5562_v25  ;;  %v5641_v51 = vadd.f32 %v4032_v47, %v1565_v44  ;;  %v4035_v52 = vadd.f32 %v4034_v50, %v4033_v48 }
 0x141   : > { %v3924_v53 = vpop.f32.mrb[32].mxu0  ;;  %v5643_v54 = vadd.f32 %v4035_v52, %v1568_v49 }
 0x142   : > { %v3925_v55 = vpop.f32.mrb[33].mxu0 }
 0x143   : > { %v3926_v56 = vadd.f32 %v3925_v55, %v3924_v53  ;;  %v3927_v58 = vpop.f32.mrb[34].mxu0  ;;  %v4036_v60 = vpop.f32.mrb[32].mxu1 }
 0x144   : > { %v3928_v63 = vpop.f32.mrb[35].mxu0  ;;  %v4037_v2 = vpop.f32.mrb[33].mxu1 }
 0x145   : > { %v1573_v0 = vadd.f32 %v3926_v56, %v5562_v25  ;;  %v3929_v1 = vadd.f32 %v3928_v63, %v3927_v58  ;;  %v4038_v3 = vadd.f32 %v4037_v2, %v4036_v60  ;;  %v4039_v4 = vpop.f32.mrb[34].mxu1 }
 0x146   : > { %v4040_v6 = vpop.f32.mrb[35].mxu1 }
 0x147   : > { %v1576_v5 = vadd.f32 %v3929_v1, %v5562_v25  ;;  %v5647_v7 = vadd.f32 %v4038_v3, %v1573_v0  ;;  %v4041_v8 = vadd.f32 %v4040_v6, %v4039_v4 }
 0x149   : > { %v3930_v9 = vpop.f32.mrb[36].mxu0  ;;  %v5649_v10 = vadd.f32 %v4041_v8, %v1576_v5 }
 0x14a   : > { %v3931_v11 = vpop.f32.mrb[37].mxu0 }
 0x14b   : > { %v3932_v13 = vadd.f32 %v3931_v11, %v3930_v9  ;;  %v3933_v14 = vpop.f32.mrb[38].mxu0  ;;  %v4042_v17 = vpop.f32.mrb[36].mxu1 }
 0x14c   : > { %v3934_v19 = vpop.f32.mrb[39].mxu0  ;;  %v4043_v22 = vpop.f32.mrb[37].mxu1 }
 0x14d   : > { %v1581_v20 = vadd.f32 %v3932_v13, %v5562_v25  ;;  %v3935_v21 = vadd.f32 %v3934_v19, %v3933_v14  ;;  %v4044_v23 = vadd.f32 %v4043_v22, %v4042_v17  ;;  %v4045_v24 = vpop.f32.mrb[38].mxu1 }
 0x14e   : > { %v4046_v27 = vpop.f32.mrb[39].mxu1 }
 0x14f   : > { %v1584_v26 = vadd.f32 %v3935_v21, %v5562_v25  ;;  %v5653_v28 = vadd.f32 %v4044_v23, %v1581_v20  ;;  %v4047_v29 = vadd.f32 %v4046_v27, %v4045_v24 }
 0x151   : > { %v3936_v30 = vpop.f32.mrb[40].mxu0  ;;  %v5655_v32 = vadd.f32 %v4047_v29, %v1584_v26 }
 0x152   : > { %v3937_v33 = vpop.f32.mrb[41].mxu0 }
 0x153   : > { %v3938_v35 = vadd.f32 %v3937_v33, %v3936_v30  ;;  %v3939_v37 = vpop.f32.mrb[42].mxu0  ;;  %v4048_v38 = vpop.f32.mrb[40].mxu1 }
 0x154   : > { %v3940_v41 = vpop.f32.mrb[43].mxu0  ;;  %v4049_v45 = vpop.f32.mrb[41].mxu1 }
 0x155   : > { %v1589_v42 = vadd.f32 %v3938_v35, %v5562_v25  ;;  %v3941_v44 = vadd.f32 %v3940_v41, %v3939_v37  ;;  %v4050_v46 = vadd.f32 %v4049_v45, %v4048_v38  ;;  %v4051_v47 = vpop.f32.mrb[42].mxu1 }
 0x156   : > { %v4052_v49 = vpop.f32.mrb[43].mxu1 }
 0x157   : > { %v1592_v48 = vadd.f32 %v3941_v44, %v5562_v25  ;;  %v5659_v50 = vadd.f32 %v4050_v46, %v1589_v42  ;;  %v4053_v52 = vadd.f32 %v4052_v49, %v4051_v47 }
 0x159   : > { %v3942_v53 = vpop.f32.mrb[44].mxu0  ;;  %v5661_v55 = vadd.f32 %v4053_v52, %v1592_v48 }
 0x15a   : > { %v3943_v56 = vpop.f32.mrb[45].mxu0 }
 0x15b   : > { %v3944_v58 = vadd.f32 %v3943_v56, %v3942_v53  ;;  %v3945_v60 = vpop.f32.mrb[46].mxu0  ;;  %v4054_v63 = vpop.f32.mrb[44].mxu1 }
 0x15c   : > { %v3946_v0 = vpop.f32.mrb[47].mxu0  ;;  %v4055_v3 = vpop.f32.mrb[45].mxu1 }
 0x15d   : > { %v1597_v1 = vadd.f32 %v3944_v58, %v5562_v25  ;;  %v3947_v2 = vadd.f32 %v3946_v0, %v3945_v60  ;;  %v4056_v4 = vadd.f32 %v4055_v3, %v4054_v63  ;;  %v4057_v5 = vpop.f32.mrb[46].mxu1 }
 0x15e   : > { %v4058_v8 = vpop.f32.mrb[47].mxu1 }
 0x15f   : > { %v1600_v6 = vadd.f32 %v3947_v2, %v5562_v25  ;;  %v5665_v9 = vadd.f32 %v4056_v4, %v1597_v1  ;;  %v4059_v11 = vadd.f32 %v4058_v8, %v4057_v5 }
 0x161   : > { %v3948_v13 = vpop.f32.mrb[48].mxu0  ;;  %v5667_v14 = vadd.f32 %v4059_v11, %v1600_v6 }
 0x162   : > { %v3949_v17 = vpop.f32.mrb[49].mxu0 }
 0x163   : > { %v3950_v19 = vadd.f32 %v3949_v17, %v3948_v13  ;;  %v3951_v20 = vpop.f32.mrb[50].mxu0  ;;  %v4060_v21 = vpop.f32.mrb[48].mxu1 }
 0x164   : > { %v3952_v22 = vpop.f32.mrb[51].mxu0  ;;  %v4061_v26 = vpop.f32.mrb[49].mxu1 }
 0x165   : > { %v1605_v23 = vadd.f32 %v3950_v19, %v5562_v25  ;;  %v3953_v24 = vadd.f32 %v3952_v22, %v3951_v20  ;;  %v4062_v27 = vadd.f32 %v4061_v26, %v4060_v21  ;;  %v4063_v29 = vpop.f32.mrb[50].mxu1 }
 0x166   : > { %v4064_v33 = vpop.f32.mrb[51].mxu1 }
 0x167   : > { %v1608_v30 = vadd.f32 %v3953_v24, %v5562_v25  ;;  %v5671_v35 = vadd.f32 %v4062_v27, %v1605_v23  ;;  %v4065_v37 = vadd.f32 %v4064_v33, %v4063_v29 }
 0x169   : > { %v3954_v38 = vpop.f32.mrb[52].mxu0  ;;  %v5673_v41 = vadd.f32 %v4065_v37, %v1608_v30 }
 0x16a   : > { %v3955_v42 = vpop.f32.mrb[53].mxu0 }
 0x16b   : > { %v3956_v44 = vadd.f32 %v3955_v42, %v3954_v38  ;;  %v3957_v45 = vpop.f32.mrb[54].mxu0  ;;  %v4066_v46 = vpop.f32.mrb[52].mxu1 }
 0x16c   : > { %v3958_v47 = vpop.f32.mrb[55].mxu0  ;;  %v4067_v52 = vpop.f32.mrb[53].mxu1 }
 0x16d   : > { %v1613_v48 = vadd.f32 %v3956_v44, %v5562_v25  ;;  %v3959_v49 = vadd.f32 %v3958_v47, %v3957_v45  ;;  %v4068_v53 = vadd.f32 %v4067_v52, %v4066_v46  ;;  %v4069_v56 = vpop.f32.mrb[54].mxu1 }
 0x16e   : > { %v4070_v60 = vpop.f32.mrb[55].mxu1 }
 0x16f   : > { %v1616_v58 = vadd.f32 %v3959_v49, %v5562_v25  ;;  %v5677_v63 = vadd.f32 %v4068_v53, %v1613_v48  ;;  %v4071_v0 = vadd.f32 %v4070_v60, %v4069_v56 }
 0x171   : > { %v3960_v1 = vpop.f32.mrb[56].mxu0  ;;  %v5679_v2 = vadd.f32 %v4071_v0, %v1616_v58 }
 0x172   : > { %v3961_v3 = vpop.f32.mrb[57].mxu0 }
 0x173   : > { %v3962_v4 = vadd.f32 %v3961_v3, %v3960_v1  ;;  %v3963_v5 = vpop.f32.mrb[58].mxu0  ;;  %v4072_v6 = vpop.f32.mrb[56].mxu1 }
 0x174   : > { %v3964_v8 = vpop.f32.mrb[59].mxu0  ;;  %v4073_v17 = vpop.f32.mrb[57].mxu1 }
 0x175   : > { %v1621_v11 = vadd.f32 %v3962_v4, %v5562_v25  ;;  %v3965_v13 = vadd.f32 %v3964_v8, %v3963_v5  ;;  %v4074_v19 = vadd.f32 %v4073_v17, %v4072_v6  ;;  %v4075_v20 = vpop.f32.mrb[58].mxu1 }
 0x176   : > { %v4076_v22 = vpop.f32.mrb[59].mxu1 }
 0x177   : > { %v1624_v21 = vadd.f32 %v3965_v13, %v5562_v25  ;;  %v5683_v23 = vadd.f32 %v4074_v19, %v1621_v11  ;;  %v4077_v24 = vadd.f32 %v4076_v22, %v4075_v20 }
 0x179   : > { %v3966_v26 = vpop.f32.mrb[60].mxu0  ;;  %v5685_v27 = vadd.f32 %v4077_v24, %v1624_v21 }
 0x17a   : > { %v3967_v29 = vpop.f32.mrb[61].mxu0 }
 0x17b   : > { %v3968_v30 = vadd.f32 %v3967_v29, %v3966_v26  ;;  %v3969_v33 = vpop.f32.mrb[62].mxu0  ;;  %v4078_v37 = vpop.f32.mrb[60].mxu1 }
 0x17c   : > { %v3970_v38 = vpop.f32.mrb[63].mxu0  ;;  %v4079_v45 = vpop.f32.mrb[61].mxu1 }
 0x17d   : > { %v1629_v42 = vadd.f32 %v3968_v30, %v5562_v25  ;;  %v3971_v44 = vadd.f32 %v3970_v38, %v3969_v33  ;;  %v4080_v46 = vadd.f32 %v4079_v45, %v4078_v37  ;;  %v4081_v47 = vpop.f32.mrb[62].mxu1 }
 0x17e   : > { %v4082_v49 = vpop.f32.mrb[63].mxu1 }
 0x17f   : > { %v1632_v48 = vadd.f32 %v3971_v44, %v5562_v25  ;;  %v5689_v52 = vadd.f32 %v4080_v46, %v1629_v42  ;;  %v4083_v53 = vadd.f32 %v4082_v49, %v4081_v47 }
 0x181   : > { %v4100_v56 = vpop.f32.mrb[64].mxu0  ;;  %v5691_v58 = vadd.f32 %v4083_v53, %v1632_v48 }
 0x182   : > { %v4101_v60 = vpop.f32.mrb[65].mxu0 }
 0x183   : > { %v4102_v0 = vadd.f32 %v4101_v60, %v4100_v56  ;;  %v4103_v1 = vpop.f32.mrb[66].mxu0  ;;  %v4289_v4 = vpop.f32.mrb[64].mxu1 }
 0x184   : > { %v4104_v3 = vpop.f32.mrb[67].mxu0  ;;  %v1991_v8 = vpop.f32.mrb[65].mxu1 }
 0x185   : > { %v4105_v5 = vadd.f32 %v4104_v3, %v4103_v1  ;;  %v1831_v6 = vadd.f32 %v4102_v0, %v5568_v40  ;;  %v4290_v11 = vpop.f32.mrb[66].mxu1 }
 0x186   : > { %v1994_v17 = vpop.f32.mrb[67].mxu1 }
 0x187   : > { %v1992_v13 = vadd.f32 %v1991_v8, %v1831_v6  ;;  %v1834_v25 = vadd.f32 %v4105_v5, %v5570_v43 }
 0x189   : > { %v3731_v19 = vmul.f32 -1.442695, %v1992_v13  ;;  %v1995_v20 = vadd.f32 %v1994_v17, %v1834_v25  ;;  %v4106_v21 = vpop.f32.mrb[68].mxu0 }
 0x18a   : > { %v4107_v22 = vpop.f32.mrb[69].mxu0 }
 0x18b   : > { %4738 = vpow2.f32 %v3731_v19  ;;  %v3732_v24 = vmul.f32 -1.442695, %v1995_v20  ;;  %v4108_v26 = vadd.f32 %v4107_v22, %v4106_v21  ;;  %v4109_v29 = vpop.f32.mrb[70].mxu0  ;;  %v4293_v33 = vpop.f32.mrb[68].mxu1 }
 0x18c   : > { %v4110_v30 = vpop.f32.mrb[71].mxu0  ;;  %v2007_v38 = vpop.f32.mrb[69].mxu1 }
 0x18d   : > { %4740 = vpow2.f32 %v3732_v24  ;;  %v1839_v37 = vadd.f32 %v4108_v26, %v5579_v59  ;;  %v4111_v40 = vadd.f32 %v4110_v30, %v4109_v29  ;;  %v4294_v42 = vpop.f32.mrb[70].mxu1 }
 0x18e   : > { %v2010_v45 = vpop.f32.mrb[71].mxu1 }
 0x18f   : > { %v2000_v44 = vadd.f32 %v4289_v4, %v1839_v37  ;;  %v1842_v43 = vadd.f32 %v4111_v40, %v5581_v62 }
 0x191   : > { %v3733_v46 = vmul.f32 -1.442695, %v2000_v44  ;;  %v2003_v47 = vadd.f32 %v4290_v11, %v1842_v43  ;;  %v4112_v48 = vpop.f32.mrb[72].mxu0 }
 0x192   : > { %v4113_v49 = vpop.f32.mrb[73].mxu0 }
 0x193   : > { %4742 = vpow2.f32 %v3733_v46  ;;  %v3734_v53 = vmul.f32 -1.442695, %v2003_v47  ;;  %v4114_v56 = vadd.f32 %v4113_v49, %v4112_v48  ;;  %v4115_v60 = vpop.f32.mrb[74].mxu0  ;;  %v5697_v1 = vpop.f32.mrb[72].mxu1  ;;  %v4722_v49 = vld [vmem:[%s6047_s5] sm:$0xff]  }
 0x194   : > { %v4116_v0 = vpop.f32.mrb[75].mxu0  ;;  %v2023_v4 = vpop.f32.mrb[73].mxu1  ;;  %4367 = vmatprep.subr.bf16.mxu0 %v4722_v49 }
 0x195   : > { %v4739_v3 = vpop.eup %4738  ;;  %4744 = vpow2.f32 %v3734_v53  ;;  %v4117_v59 = vadd.f32 %v4116_v0, %v4115_v60  ;;  %v1847_v5 = vadd.f32 %v4114_v56, %v5593_v15  ;;  %v5700_v62 = vpop.f32.mrb[74].mxu1  ;;  %4368 = vmatpush3.bf16.msra.mxu0 %v4722_v49 }
 0x196   : > { %v2214_v6 = vadd.f32 1.0, %v4739_v3  ;;  %v5703_v25 = vpop.f32.mrb[75].mxu1 }
 0x197   : > { %v4741_v8 = vpop.eup %4740  ;;  %v2008_v11 = vadd.f32 %v2007_v38, %v1847_v5  ;;  %v1850_v13 = vadd.f32 %v4117_v59, %v5595_v18 }
 0x198   : > { %v2215_v17 = vadd.f32 1.0, %v4741_v8  ;;  %4746 = vrcp.f32 %v2214_v6  ;;  %v4724_v6 = vld [vmem:[%s6047_s5 + $0x10] sm:$0xff]  }
 0x199   : > { %v3735_v19 = vmul.f32 -1.442695, %v2008_v11  ;;  %v2011_v20 = vadd.f32 %v2010_v45, %v1850_v13  ;;  %v4118_v21 = vpop.f32.mrb[76].mxu0 }
 0x19a   : > { %4748 = vrcp.f32 %v2215_v17  ;;  %v4119_v22 = vpop.f32.mrb[77].mxu0 }
 0x19b   : > { %4750 = vpow2.f32 %v3735_v19  ;;  %v3736_v24 = vmul.f32 -1.442695, %v2011_v20  ;;  %v4120_v15 = vadd.f32 %v4119_v22, %v4118_v21  ;;  %v4121_v26 = vpop.f32.mrb[78].mxu0  ;;  %v5705_v30 = vpop.f32.mrb[76].mxu1 }
 0x19c   : > { %v4122_v29 = vpop.f32.mrb[79].mxu0  ;;  %v5708_v38 = vpop.f32.mrb[77].mxu1 }
 0x19d   : > { %v4743_v37 = vpop.eup %4742  ;;  %4752 = vpow2.f32 %v3736_v24  ;;  %v1855_v18 = vadd.f32 %v4120_v15, %v5607_v36  ;;  %v4123_v40 = vadd.f32 %v4122_v29, %v4121_v26  ;;  %v5710_v43 = vpop.f32.mrb[78].mxu1  ;;  %v4723_v36 = vld [vmem:[%s6047_s5 + $0x8] sm:$0xff]  }
 0x19e   : > { %v2216_v44 = vadd.f32 1.0, %v4743_v37  ;;  %v5713_v48 = vpop.f32.mrb[79].mxu1  ;;  %4369 = vmatprep.subr.bf16.mxu0 %v4723_v36 }
 0x19f   : > { %v4745_v45 = vpop.eup %4744  ;;  %v2016_v46 = vadd.f32 %v4293_v33, %v1855_v18  ;;  %v1858_v47 = vadd.f32 %v4123_v40, %v5609_v39  ;;  %4370 = vmatpush3.bf16.msra.mxu0 %v4723_v36 }
 0x1a0   : > { %v2217_v53 = vadd.f32 1.0, %v4745_v45  ;;  %4754 = vrcp.f32 %v2216_v44  ;;  %4371 = vmatprep.subr.bf16.mxu0 %v4724_v6 }
 0x1a1   : > { %v3737_v56 = vmul.f32 -1.442695, %v2016_v46  ;;  %v2019_v60 = vadd.f32 %v4294_v42, %v1858_v47  ;;  %v4124_v0 = vpop.f32.mrb[80].mxu0 }
 0x1a2   : > { %4756 = vrcp.f32 %v2217_v53  ;;  %v4125_v33 = vpop.f32.mrb[81].mxu0  ;;  %v4747_v39 = vpop.eup %4746 }
 0x1a3   : > { %4758 = vpow2.f32 %v3737_v56  ;;  %v3738_v3 = vmul.f32 -1.442695, %v2019_v60  ;;  %v4126_v59 = vadd.f32 %v4125_v33, %v4124_v0  ;;  %v4127_v5 = vpop.f32.mrb[82].mxu0  ;;  %v5724_v13 = vpop.f32.mrb[80].mxu1  ;;  %4372 = vmatpush3.bf16.msra.mxu0 %v4724_v6 }
 0x1a4   : > { %v4749_v8 = vpop.eup %4748  ;;  %v4128_v11 = vpop.f32.mrb[83].mxu0 }
 0x1a5   : > { %v4751_v42 = vpop.eup %4750  ;;  %4760 = vpow2.f32 %v3738_v3  ;;  %v4129_v17 = vadd.f32 %v4128_v11, %v4127_v5  ;;  %v1863_v19 = vadd.f32 %v4126_v59, %v5620_v57  ;;  %v2310_v20 = vpack.c.bf16 %v4749_v8, %v4747_v39  ;;  %v5727_v21 = vpop.f32.mrb[81].mxu1 }
 0x1a6   : > { %v2218_v22 = vadd.f32 1.0, %v4751_v42  ;;  %v5729_v24 = vpop.f32.mrb[82].mxu1 }
 0x1a7   : > { %v4753_v15 = vpop.eup %4752  ;;  %v2024_v26 = vadd.f32 %v2023_v4, %v1863_v19  ;;  %4335 = vmatprep.mubr.bf16.mxu1 %v2310_v20  ;;  %v1866_v29 = vadd.f32 %v4129_v17, %v5622_v61  ;;  %v5732_v37 = vpop.f32.mrb[83].mxu1 }
 0x1a8   : > { %v2219_v18 = vadd.f32 1.0, %v4753_v15  ;;  %4762 = vrcp.f32 %v2218_v22 }
 0x1a9   : > { %v3739_v40 = vmul.f32 -1.442695, %v2024_v26  ;;  %v2027_v57 = vadd.f32 %v5703_v25, %v1866_v29  ;;  %v4130_v44 = vpop.f32.mrb[84].mxu0 }
 0x1aa   : > { %4764 = vrcp.f32 %v2219_v18  ;;  %v4131_v45 = vpop.f32.mrb[85].mxu0  ;;  %v4755_v46 = vpop.eup %4754 }
 0x1ab   : > { %4766 = vpow2.f32 %v3739_v40  ;;  %v3740_v47 = vmul.f32 -1.442695, %v2027_v57  ;;  %v4132_v49 = vadd.f32 %v4131_v45, %v4130_v44  ;;  %v4133_v4 = vpop.f32.mrb[86].mxu0  ;;  %v5735_v61 = vpop.f32.mrb[84].mxu1 }
 0x1ac   : > { %v4757_v36 = vpop.eup %4756  ;;  %v4134_v53 = vpop.f32.mrb[87].mxu0 }
 0x1ad   : > { %v4759_v56 = vpop.eup %4758  ;;  %4768 = vpow2.f32 %v3740_v47  ;;  %v1871_v60 = vadd.f32 %v4132_v49, %v5629_v12  ;;  %v4135_v0 = vadd.f32 %v4134_v53, %v4133_v4  ;;  %v2311_v33 = vpack.c.bf16 %v4757_v36, %v4755_v46  ;;  %v5738_v25 = vpop.f32.mrb[85].mxu1 }
 0x1ae   : > { %v2220_v39 = vadd.f32 1.0, %v4759_v56  ;;  %v5740_v3 = vpop.f32.mrb[86].mxu1 }
 0x1af   : > { %v4761_v59 = vpop.eup %4760  ;;  %v2032_v5 = vadd.f32 %v5697_v1, %v1871_v60  ;;  %v1874_v6 = vadd.f32 %v4135_v0, %v5631_v16  ;;  %4336 = vmatmul.mubr.bf16.vlgmr.msra.gmra.mrb[96].mxu1 %v2311_v33  ;;  %v5744_v8 = vpop.f32.mrb[87].mxu1 }
 0x1b0   : > { %v2221_v11 = vadd.f32 1.0, %v4761_v59  ;;  %4770 = vrcp.f32 %v2220_v39 }
 0x1b1   : > { %v3741_v42 = vmul.f32 -1.442695, %v2032_v5  ;;  %v2035_v12 = vadd.f32 %v5700_v62, %v1874_v6  ;;  %v4136_v17 = vpop.f32.mrb[88].mxu0 }
 0x1b2   : > { %4772 = vrcp.f32 %v2221_v11  ;;  %v4137_v19 = vpop.f32.mrb[89].mxu0  ;;  %v4763_v20 = vpop.eup %4762 }
 0x1b3   : > { %4774 = vpow2.f32 %v3741_v42  ;;  %v3742_v22 = vmul.f32 -1.442695, %v2035_v12  ;;  %v4138_v15 = vadd.f32 %v4137_v19, %v4136_v17  ;;  %v4139_v26 = vpop.f32.mrb[90].mxu0  ;;  %v5747_v18 = vpop.f32.mrb[88].mxu1 }
 0x1b4   : > { %v4765_v29 = vpop.eup %4764  ;;  %v4140_v1 = vpop.f32.mrb[91].mxu0 }
 0x1b5   : > { %v4767_v16 = vpop.eup %4766  ;;  %4776 = vpow2.f32 %v3742_v22  ;;  %v4141_v40 = vadd.f32 %v4140_v1, %v4139_v26  ;;  %v1879_v57 = vadd.f32 %v4138_v15, %v5635_v31  ;;  %v2312_v44 = vpack.c.bf16 %v4765_v29, %v4763_v20  ;;  %v5750_v45 = vpop.f32.mrb[89].mxu1 }
 0x1b6   : > { %v2222_v62 = vadd.f32 1.0, %v4767_v16  ;;  %v5752_v46 = vpop.f32.mrb[90].mxu1 }
 0x1b7   : > { %v4769_v47 = vpop.eup %4768  ;;  %v2040_v49 = vadd.f32 %v5708_v38, %v1879_v57  ;;  %4339 = vmatprep.mubr.bf16.mxu1 %v2312_v44  ;;  %v1882_v4 = vadd.f32 %v4141_v40, %v5637_v34  ;;  %v5756_v36 = vpop.f32.mrb[91].mxu1 }
 0x1b8   : > { %v2223_v53 = vadd.f32 1.0, %v4769_v47  ;;  %4778 = vrcp.f32 %v2222_v62 }
 0x1b9   : > { %v3743_v56 = vmul.f32 -1.442695, %v2040_v49  ;;  %v2043_v60 = vadd.f32 %v5713_v48, %v1882_v4  ;;  %v4142_v31 = vpop.f32.mrb[92].mxu0 }
 0x1ba   : > { %4780 = vrcp.f32 %v2223_v53  ;;  %v4143_v0 = vpop.f32.mrb[93].mxu0  ;;  %v4771_v33 = vpop.eup %4770 }
 0x1bb   : > { %4782 = vpow2.f32 %v3743_v56  ;;  %v3744_v39 = vmul.f32 -1.442695, %v2043_v60  ;;  %v4144_v59 = vadd.f32 %v4143_v0, %v4142_v31  ;;  %v4145_v5 = vpop.f32.mrb[94].mxu0  ;;  %v5759_v11 = vpop.f32.mrb[92].mxu1 }
 0x1bc   : > { %v4773_v6 = vpop.eup %4772  ;;  %v4146_v38 = vpop.f32.mrb[95].mxu0 }
 0x1bd   : > { %v4775_v34 = vpop.eup %4774  ;;  %4784 = vpow2.f32 %v3744_v39  ;;  %v1887_v42 = vadd.f32 %v4144_v59, %v5641_v51  ;;  %v4147_v12 = vadd.f32 %v4146_v38, %v4145_v5  ;;  %v2313_v17 = vpack.c.bf16 %v4773_v6, %v4771_v33  ;;  %v5762_v19 = vpop.f32.mrb[93].mxu1 }
 0x1be   : > { %v2224_v48 = vadd.f32 1.0, %v4775_v34  ;;  %v5764_v20 = vpop.f32.mrb[94].mxu1 }
 0x1bf   : > { %v4777_v22 = vpop.eup %4776  ;;  %v2048_v15 = vadd.f32 %v5705_v30, %v1887_v42  ;;  %v1890_v26 = vadd.f32 %v4147_v12, %v5643_v54  ;;  %4340 = vmatmul.mubr.bf16.gmra.mrb[100].mxu1 %v2313_v17  ;;  %v5768_v29 = vpop.f32.mrb[95].mxu1 }
 0x1c0   : > { %v2225_v1 = vadd.f32 1.0, %v4777_v22  ;;  %4786 = vrcp.f32 %v2224_v48 }
 0x1c1   : > { %v3745_v16 = vmul.f32 -1.442695, %v2048_v15  ;;  %v2051_v51 = vadd.f32 %v5710_v43, %v1890_v26  ;;  %v4148_v40 = vpop.f32.mrb[96].mxu0 }
 0x1c2   : > { %4788 = vrcp.f32 %v2225_v1  ;;  %v4149_v57 = vpop.f32.mrb[97].mxu0  ;;  %v4779_v44 = vpop.eup %4778 }
 0x1c3   : > { %4790 = vpow2.f32 %v3745_v16  ;;  %v3746_v62 = vmul.f32 -1.442695, %v2051_v51  ;;  %v4150_v47 = vadd.f32 %v4149_v57, %v4148_v40  ;;  %v4151_v49 = vpop.f32.mrb[98].mxu0 }
 0x1c4   : > { %v4781_v4 = vpop.eup %4780  ;;  %v4152_v30 = vpop.f32.mrb[99].mxu0 }
 0x1c5   : > { %v4783_v53 = vpop.eup %4782  ;;  %4792 = vpow2.f32 %v3746_v62  ;;  %v4153_v54 = vadd.f32 %v4152_v30, %v4151_v49  ;;  %v1895_v56 = vadd.f32 %v4150_v47, %v5647_v7  ;;  %v2314_v60 = vpack.c.bf16 %v4781_v4, %v4779_v44 }
 0x1c6   : > { %v2226_v31 = vadd.f32 1.0, %v4783_v53 }
 0x1c7   : > { %v4785_v0 = vpop.eup %4784  ;;  %v2056_v43 = vadd.f32 %v5727_v21, %v1895_v56  ;;  %4343 = vmatprep.mubr.bf16.mxu1 %v2314_v60  ;;  %v1898_v33 = vadd.f32 %v4153_v54, %v5649_v10 }
 0x1c8   : > { %v2227_v39 = vadd.f32 1.0, %v4785_v0  ;;  %4794 = vrcp.f32 %v2226_v31 }
 0x1c9   : > { %v3747_v59 = vmul.f32 -1.442695, %v2056_v43  ;;  %v2059_v5 = vadd.f32 %v5732_v37, %v1898_v33  ;;  %v4154_v6 = vpop.f32.mrb[100].mxu0 }
 0x1ca   : > { %4796 = vrcp.f32 %v2227_v39  ;;  %v4155_v38 = vpop.f32.mrb[101].mxu0  ;;  %v4787_v34 = vpop.eup %4786 }
 0x1cb   : > { %4798 = vpow2.f32 %v3747_v59  ;;  %v3748_v42 = vmul.f32 -1.442695, %v2059_v5  ;;  %v4156_v7 = vadd.f32 %v4155_v38, %v4154_v6  ;;  %v4157_v12 = vpop.f32.mrb[102].mxu0 }
 0x1cc   : > { %v4789_v17 = vpop.eup %4788  ;;  %v4158_v48 = vpop.f32.mrb[103].mxu0 }
 0x1cd   : > { %v4791_v22 = vpop.eup %4790  ;;  %4800 = vpow2.f32 %v3748_v42  ;;  %v1903_v21 = vadd.f32 %v4156_v7, %v5653_v28  ;;  %v4159_v10 = vadd.f32 %v4158_v48, %v4157_v12  ;;  %v2315_v15 = vpack.c.bf16 %v4789_v17, %v4787_v34 }
 0x1ce   : > { %v2228_v26 = vadd.f32 1.0, %v4791_v22 }
 0x1cf   : > { %v4793_v1 = vpop.eup %4792  ;;  %v2064_v37 = vadd.f32 %v5724_v13, %v1903_v21  ;;  %v1906_v16 = vadd.f32 %v4159_v10, %v5655_v32  ;;  %4344 = vmatmul.mubr.bf16.gmra.mrb[104].mxu1 %v2315_v15 }
 0x1d0   : > { %v2229_v51 = vadd.f32 1.0, %v4793_v1  ;;  %4802 = vrcp.f32 %v2228_v26 }
 0x1d1   : > { %v3749_v40 = vmul.f32 -1.442695, %v2064_v37  ;;  %v2067_v57 = vadd.f32 %v5729_v24, %v1906_v16  ;;  %v4160_v44 = vpop.f32.mrb[104].mxu0 }
 0x1d2   : > { %4804 = vrcp.f32 %v2229_v51  ;;  %v4161_v62 = vpop.f32.mrb[105].mxu0  ;;  %v4795_v47 = vpop.eup %4794 }
 0x1d3   : > { %4806 = vpow2.f32 %v3749_v40  ;;  %v3750_v28 = vmul.f32 -1.442695, %v2067_v57  ;;  %v4162_v49 = vadd.f32 %v4161_v62, %v4160_v44  ;;  %v4163_v4 = vpop.f32.mrb[106].mxu0 }
 0x1d4   : > { %v4797_v30 = vpop.eup %4796  ;;  %v4164_v53 = vpop.f32.mrb[107].mxu0 }
 0x1d5   : > { %v4799_v54 = vpop.eup %4798  ;;  %4808 = vpow2.f32 %v3750_v28  ;;  %v4165_v13 = vadd.f32 %v4164_v53, %v4163_v4  ;;  %v1911_v32 = vadd.f32 %v4162_v49, %v5659_v50  ;;  %v2316_v56 = vpack.c.bf16 %v4797_v30, %v4795_v47 }
 0x1d6   : > { %v2230_v60 = vadd.f32 1.0, %v4799_v54 }
 0x1d7   : > { %v4801_v31 = vpop.eup %4800  ;;  %v2072_v24 = vadd.f32 %v5738_v25, %v1911_v32  ;;  %4347 = vmatprep.mubr.bf16.mxu1 %v2316_v56  ;;  %v1914_v0 = vadd.f32 %v4165_v13, %v5661_v55 }
 0x1d8   : > { %v2231_v43 = vadd.f32 1.0, %v4801_v31  ;;  %4810 = vrcp.f32 %v2230_v60 }
 0x1d9   : > { %v3751_v33 = vmul.f32 -1.442695, %v2072_v24  ;;  %v2075_v39 = vadd.f32 %v5744_v8, %v1914_v0  ;;  %v4166_v59 = vpop.f32.mrb[108].mxu0 }
 0x1da   : > { %4812 = vrcp.f32 %v2231_v43  ;;  %v4167_v5 = vpop.f32.mrb[109].mxu0  ;;  %v4803_v6 = vpop.eup %4802 }
 0x1db   : > { %4814 = vpow2.f32 %v3751_v33  ;;  %v3752_v38 = vmul.f32 -1.442695, %v2075_v39  ;;  %v4168_v50 = vadd.f32 %v4167_v5, %v4166_v59  ;;  %v4169_v34 = vpop.f32.mrb[110].mxu0 }
 0x1dc   : > { %v4805_v42 = vpop.eup %4804  ;;  %v4170_v7 = vpop.f32.mrb[111].mxu0 }
 0x1dd   : > { %v4807_v12 = vpop.eup %4806  ;;  %4816 = vpow2.f32 %v3752_v38  ;;  %v1919_v25 = vadd.f32 %v4168_v50, %v5665_v9  ;;  %v4171_v55 = vadd.f32 %v4170_v7, %v4169_v34  ;;  %v2317_v17 = vpack.c.bf16 %v4805_v42, %v4803_v6 }
 0x1de   : > { %v2232_v48 = vadd.f32 1.0, %v4807_v12 }
 0x1df   : > { %v4809_v22 = vpop.eup %4808  ;;  %v2080_v8 = vadd.f32 %v5735_v61, %v1919_v25  ;;  %v1922_v21 = vadd.f32 %v4171_v55, %v5667_v14  ;;  %4348 = vmatmul.mubr.bf16.gmra.mrb[108].mxu1 %v2317_v17 }
 0x1e0   : > { %v2233_v10 = vadd.f32 1.0, %v4809_v22  ;;  %4818 = vrcp.f32 %v2232_v48 }
 0x1e1   : > { %v3753_v15 = vmul.f32 -1.442695, %v2080_v8  ;;  %v2083_v26 = vadd.f32 %v5740_v3, %v1922_v21  ;;  %v4172_v1 = vpop.f32.mrb[112].mxu0 }
 0x1e2   : > { %4820 = vrcp.f32 %v2233_v10  ;;  %v4173_v37 = vpop.f32.mrb[113].mxu0  ;;  %v4811_v16 = vpop.eup %4810 }
 0x1e3   : > { %4822 = vpow2.f32 %v3753_v15  ;;  %v3754_v9 = vmul.f32 -1.442695, %v2083_v26  ;;  %v4174_v51 = vadd.f32 %v4173_v37, %v4172_v1  ;;  %v4175_v40 = vpop.f32.mrb[114].mxu0 }
 0x1e4   : > { %v4813_v57 = vpop.eup %4812  ;;  %v4176_v44 = vpop.f32.mrb[115].mxu0 }
 0x1e5   : > { %v4815_v62 = vpop.eup %4814  ;;  %4824 = vpow2.f32 %v3754_v9  ;;  %v4177_v61 = vadd.f32 %v4176_v44, %v4175_v40  ;;  %v1927_v14 = vadd.f32 %v4174_v51, %v5671_v35  ;;  %v2318_v47 = vpack.c.bf16 %v4813_v57, %v4811_v16 }
 0x1e6   : > { %v2234_v28 = vadd.f32 1.0, %v4815_v62 }
 0x1e7   : > { %v4817_v49 = vpop.eup %4816  ;;  %v2088_v3 = vadd.f32 %v5750_v45, %v1927_v14  ;;  %4351 = vmatprep.mubr.bf16.mxu1 %v2318_v47  ;;  %v1930_v4 = vadd.f32 %v4177_v61, %v5673_v41 }
 0x1e8   : > { %v2235_v30 = vadd.f32 1.0, %v4817_v49  ;;  %4826 = vrcp.f32 %v2234_v28 }
 0x1e9   : > { %v3755_v53 = vmul.f32 -1.442695, %v2088_v3  ;;  %v2091_v54 = vadd.f32 %v5756_v36, %v1930_v4  ;;  %v4178_v13 = vpop.f32.mrb[116].mxu0 }
 0x1ea   : > { %4828 = vrcp.f32 %v2235_v30  ;;  %v4179_v32 = vpop.f32.mrb[117].mxu0  ;;  %v4819_v56 = vpop.eup %4818 }
 0x1eb   : > { %4830 = vpow2.f32 %v3755_v53  ;;  %v3756_v60 = vmul.f32 -1.442695, %v2091_v54  ;;  %v4180_v35 = vadd.f32 %v4179_v32, %v4178_v13  ;;  %v4181_v31 = vpop.f32.mrb[118].mxu0 }
 0x1ec   : > { %v4821_v24 = vpop.eup %4820  ;;  %v4182_v0 = vpop.f32.mrb[119].mxu0 }
 0x1ed   : > { %v4823_v43 = vpop.eup %4822  ;;  %4832 = vpow2.f32 %v3756_v60  ;;  %v1935_v45 = vadd.f32 %v4180_v35, %v5677_v63  ;;  %v4183_v41 = vadd.f32 %v4182_v0, %v4181_v31  ;;  %v2319_v33 = vpack.c.bf16 %v4821_v24, %v4819_v56 }
 0x1ee   : > { %v2236_v39 = vadd.f32 1.0, %v4823_v43  ;;  %v4725_v43 = vld [vmem:[%s6047_s5 + $0x18] sm:$0xff]  }
 0x1ef   : > { %v4825_v59 = vpop.eup %4824  ;;  %v2096_v36 = vadd.f32 %v5747_v18, %v1935_v45  ;;  %v1938_v5 = vadd.f32 %v4183_v41, %v5679_v2  ;;  %4352 = vmatmul.mubr.bf16.gmra.mrb[112].mxu1 %v2319_v33  ;;  %4373 = vmatprep.subr.bf16.mxu0 %v4725_v43  ;;  %v4726_v33 = vld [vmem:[%s6047_s5 + $0x20] sm:$0xff]  }
 0x1f0   : > { %v2237_v6 = vadd.f32 1.0, %v4825_v59  ;;  %4834 = vrcp.f32 %v2236_v39  ;;  %4374 = vmatpush3.bf16.msra.mxu0 %v4725_v43  ;;  %v4727_v59 = vld [vmem:[%s6047_s5 + $0x28] sm:$0xff]  }
 0x1f1   : > { %v3757_v38 = vmul.f32 -1.442695, %v2096_v36  ;;  %v2099_v50 = vadd.f32 %v5752_v46, %v1938_v5  ;;  %v4184_v34 = vpop.f32.mrb[120].mxu0  ;;  %4375 = vmatprep.subr.bf16.mxu0 %v4726_v33 }
 0x1f2   : > { %4836 = vrcp.f32 %v2237_v6  ;;  %v4185_v42 = vpop.f32.mrb[121].mxu0  ;;  %v4827_v7 = vpop.eup %4826  ;;  %v4728_v6 = vld [vmem:[%s6047_s5 + $0x30] sm:$0xff]  }
 0x1f3   : > { %4838 = vpow2.f32 %v3757_v38  ;;  %v3758_v63 = vmul.f32 -1.442695, %v2099_v50  ;;  %v4186_v12 = vadd.f32 %v4185_v42, %v4184_v34  ;;  %v4187_v25 = vpop.f32.mrb[122].mxu0  ;;  %v4729_v50 = vld [vmem:[%s6047_s5 + $0x38] sm:$0xff]   ;;  %v5821_v34 = vld [vmem:[%s6046_s4] ss:$0 sm:$0xff] }
 0x1f4   : > { %v4829_v55 = vpop.eup %4828  ;;  %v4188_v17 = vpop.f32.mrb[123].mxu0  ;;  %4376 = vmatpush3.bf16.msra.mxu0 %v4726_v33 }
 0x1f5   : > { %v4831_v48 = vpop.eup %4830  ;;  %4840 = vpow2.f32 %v3758_v63  ;;  %v4189_v18 = vadd.f32 %v4188_v17, %v4187_v25  ;;  %v1943_v2 = vadd.f32 %v4186_v12, %v5683_v23  ;;  %v2320_v22 = vpack.c.bf16 %v4829_v55, %v4827_v7  ;;  %4377 = vmatprep.subr.bf16.mxu0 %v4727_v59 }
 0x1f6   : > { %v2238_v8 = vadd.f32 1.0, %v4831_v48 }
 0x1f7   : > { %v4833_v21 = vpop.eup %4832  ;;  %v2104_v46 = vadd.f32 %v5762_v19, %v1943_v2  ;;  %4355 = vmatprep.mubr.bf16.mxu1 %v2320_v22  ;;  %v1946_v10 = vadd.f32 %v4189_v18, %v5685_v27 }
 0x1f8   : > { %v2239_v15 = vadd.f32 1.0, %v4833_v21  ;;  %4842 = vrcp.f32 %v2238_v8  ;;  %4378 = vmatpush3.bf16.msra.mxu0 %v4727_v59 }
 0x1f9   : > { %v3759_v26 = vmul.f32 -1.442695, %v2104_v46  ;;  %v2107_v1 = vadd.f32 %v5768_v29, %v1946_v10  ;;  %v4190_v37 = vpop.f32.mrb[124].mxu0  ;;  %4379 = vmatprep.subr.bf16.mxu0 %v4728_v6 }
 0x1fa   : > { %4844 = vrcp.f32 %v2239_v15  ;;  %v4191_v16 = vpop.f32.mrb[125].mxu0  ;;  %v4835_v9 = vpop.eup %4834 }
 0x1fb   : > { %4846 = vpow2.f32 %v3759_v26  ;;  %v3760_v51 = vmul.f32 -1.442695, %v2107_v1  ;;  %v4192_v23 = vadd.f32 %v4191_v16, %v4190_v37  ;;  %v4193_v40 = vpop.f32.mrb[126].mxu0 }
 0x1fc   : > { %v4837_v57 = vpop.eup %4836  ;;  %v4194_v44 = vpop.f32.mrb[127].mxu0  ;;  %4380 = vmatpush3.bf16.msra.mxu0 %v4728_v6 }
 0x1fd   : > { %v4839_v62 = vpop.eup %4838  ;;  %4848 = vpow2.f32 %v3760_v51  ;;  %v1951_v19 = vadd.f32 %v4192_v23, %v5689_v52  ;;  %v4195_v27 = vadd.f32 %v4194_v44, %v4193_v40  ;;  %v2321_v61 = vpack.c.bf16 %v4837_v57, %v4835_v9  ;;  %4381 = vmatprep.subr.bf16.mxu0 %v4729_v50 }
 0x1fe   : > { %v2240_v14 = vadd.f32 1.0, %v4839_v62 }
 0x1ff   : > { %v4841_v47 = vpop.eup %4840  ;;  %v2112_v29 = vadd.f32 %v5759_v11, %v1951_v19  ;;  %v1954_v28 = vadd.f32 %v4195_v27, %v5691_v58  ;;  %4356 = vmatmul.mubr.bf16.gmra.mrb[116].mxu1 %v2321_v61 }
 0x200   : > { %v2241_v49 = vadd.f32 1.0, %v4841_v47  ;;  %4850 = vrcp.f32 %v2240_v14  ;;  %4382 = vmatpush3.bf16.msra.mxu0 %v4729_v50 }
 0x201   : > { %v3761_v3 = vmul.f32 -1.442695, %v2112_v29  ;;  %v2115_v4 = vadd.f32 %v5764_v20, %v1954_v28 }
 0x202   : > { %4852 = vrcp.f32 %v2241_v49  ;;  %v4843_v30 = vpop.eup %4842 }
 0x203   : > { %4854 = vpow2.f32 %v3761_v3  ;;  %v3762_v53 = vmul.f32 -1.442695, %v2115_v4 }
 0x204   : > { %v4845_v54 = vpop.eup %4844 }
 0x205   : > { %v4847_v52 = vpop.eup %4846  ;;  %4856 = vpow2.f32 %v3762_v53  ;;  %v2322_v13 = vpack.c.bf16 %v4845_v54, %v4843_v30 }
 0x206   : > { %v2242_v32 = vadd.f32 1.0, %v4847_v52 }
 0x207   : > { %v4849_v56 = vpop.eup %4848  ;;  %4359 = vmatprep.mubr.bf16.mxu1 %v2322_v13 }
 0x208   : > { %v2243_v11 = vadd.f32 1.0, %v4849_v56  ;;  %4858 = vrcp.f32 %v2242_v32 }
 0x20a   : > { %4860 = vrcp.f32 %v2243_v11  ;;  %v4851_v58 = vpop.eup %4850 }
 0x20c   : > { %v4853_v60 = vpop.eup %4852 }
 0x20d   : > { %v4855_v35 = vpop.eup %4854  ;;  %v2323_v31 = vpack.c.bf16 %v4853_v60, %v4851_v58 }
 0x20e   : > { %v2244_v24 = vadd.f32 1.0, %v4855_v35 }
 0x20f   : > { %v4857_v20 = vpop.eup %4856  ;;  %4360 = vmatmul.mubr.bf16.gmra.mrb[120].mxu1 %v2323_v31 }
 0x210   : > { %v2245_v0 = vadd.f32 1.0, %v4857_v20  ;;  %4862 = vrcp.f32 %v2244_v24 }
 0x212   : > { %4864 = vrcp.f32 %v2245_v0  ;;  %v4859_v45 = vpop.eup %4858 }
 0x214   : > { %v4861_v41 = vpop.eup %4860 }
 0x215   : > { %v2324_v39 = vpack.c.bf16 %v4861_v41, %v4859_v45 }
 0x217   : > { %4363 = vmatprep.mubr.bf16.mxu1 %v2324_v39 }
 0x21a   : > { %v4863_v36 = vpop.eup %4862 }
 0x21c   : > { %v4865_v5 = vpop.eup %4864 }
 0x21d   : > { %v2325_v38 = vpack.c.bf16 %v4865_v5, %v4863_v36 }
 0x21f   : > { %4364 = vmatmul.mubr.bf16.gmra.mrb[124].mxu1 %v2325_v38 }
 0x282   : > { %v4337_v42 = vpop.f32.mrb[96].mxu1 }
 0x283   : > { %v2440_v7 = vadd.f32 %v4337_v42, %v5821_v34  ;;  %v2431_v63 = vpop.f32.mrb[97].mxu1 }
 0x284   : > { %v2432_v12 = vadd.f32 %v5821_v34, %v2431_v63  ;;  %v4338_v25 = vpop.f32.mrb[98].mxu1 }
 0x285   : > { %v3774_v55 = vmul.f32 -1.442695, %v2440_v7  ;;  %v2443_v17 = vadd.f32 %v4338_v25, %v5821_v34  ;;  %v2434_v48 = vpop.f32.mrb[99].mxu1 }
 0x286   : > { %v3772_v18 = vmul.f32 -1.442695, %v2432_v12  ;;  %v2435_v2 = vadd.f32 %v5821_v34, %v2434_v48 }
 0x287   : > { %4866 = vpow2.f32 %v3774_v55  ;;  %v3775_v22 = vmul.f32 -1.442695, %v2443_v17 }
 0x288   : > { %4868 = vpow2.f32 %v3772_v18  ;;  %v3773_v8 = vmul.f32 -1.442695, %v2435_v2 }
 0x289   : > { %4870 = vpow2.f32 %v3775_v22 }
 0x28a   : > { %4872 = vpow2.f32 %v3773_v8 }
 0x291   : > { %v4867_v21 = vpop.eup %4866 }
 0x292   : > { %v4869_v46 = vpop.eup %4868  ;;  %v2656_v10 = vadd.f32 1.0, %v4867_v21  ;;  %v4341_v15 = vpop.f32.mrb[100].mxu1 }
 0x293   : > { %v4871_v26 = vpop.eup %4870  ;;  %v2654_v1 = vadd.f32 1.0, %v4869_v46  ;;  %v2456_v37 = vadd.f32 %v4341_v15, %v5821_v34  ;;  %v2447_v16 = vpop.f32.mrb[101].mxu1 }
 0x294   : > { %v4873_v9 = vpop.eup %4872  ;;  %4874 = vrcp.f32 %v2656_v10  ;;  %v2657_v51 = vadd.f32 1.0, %v4871_v26  ;;  %v2448_v23 = vadd.f32 %v5821_v34, %v2447_v16  ;;  %v4342_v40 = vpop.f32.mrb[102].mxu1 }
 0x295   : > { %4876 = vrcp.f32 %v2654_v1  ;;  %v2655_v57 = vadd.f32 1.0, %v4873_v9  ;;  %v3778_v44 = vmul.f32 -1.442695, %v2456_v37  ;;  %v2459_v62 = vadd.f32 %v4342_v40, %v5821_v34  ;;  %v2450_v19 = vpop.f32.mrb[103].mxu1 }
 0x296   : > { %4878 = vrcp.f32 %v2657_v51  ;;  %v3776_v27 = vmul.f32 -1.442695, %v2448_v23  ;;  %v2451_v61 = vadd.f32 %v5821_v34, %v2450_v19 }
 0x297   : > { %4880 = vrcp.f32 %v2655_v57  ;;  %v3779_v14 = vmul.f32 -1.442695, %v2459_v62 }
 0x298   : > { %4882 = vpow2.f32 %v3778_v44  ;;  %v3777_v47 = vmul.f32 -1.442695, %v2451_v61 }
 0x299   : > { %4884 = vpow2.f32 %v3776_v27 }
 0x29a   : > { %4886 = vpow2.f32 %v3779_v14 }
 0x29b   : > { %4888 = vpow2.f32 %v3777_v47 }
 0x29e   : > { %v4875_v29 = vpop.eup %4874 }
 0x29f   : > { %v4877_v28 = vpop.eup %4876 }
 0x2a0   : > { %v4879_v49 = vpop.eup %4878 }
 0x2a1   : > { %v4881_v3 = vpop.eup %4880  ;;  %v2751_v4 = vpack.c.bf16 %v4879_v49, %v4875_v29 }
 0x2a2   : > { %v4883_v30 = vpop.eup %4882  ;;  %v4345_v53 = vpop.f32.mrb[104].mxu1  ;;  %v2750_v54 = vpack.c.bf16 %v4881_v3, %v4877_v28 }
 0x2a3   : > { %v4885_v52 = vpop.eup %4884  ;;  %v2660_v13 = vadd.f32 1.0, %v4883_v30  ;;  %v2472_v32 = vadd.f32 %v4345_v53, %v5821_v34  ;;  %v2463_v56 = vpop.f32.mrb[105].mxu1 }
 0x2a4   : > { %v4887_v11 = vpop.eup %4886  ;;  %v2658_v58 = vadd.f32 1.0, %v4885_v52  ;;  %v2464_v60 = vadd.f32 %v5821_v34, %v2463_v56  ;;  %v4346_v35 = vpop.f32.mrb[106].mxu1  ;;  %4383 = vmatprep.mubr.bf16.mxu0 %v2750_v54 }
 0x2a5   : > { %v4889_v31 = vpop.eup %4888  ;;  %4890 = vrcp.f32 %v2660_v13  ;;  %v2661_v24 = vadd.f32 1.0, %v4887_v11  ;;  %v3782_v20 = vmul.f32 -1.442695, %v2472_v32  ;;  %v2475_v0 = vadd.f32 %v4346_v35, %v5821_v34  ;;  %v2466_v43 = vpop.f32.mrb[107].mxu1  ;;  %4384 = vmatmul.mubr.bf16.vlgmr.msra.gmra.mrb[128].mxu0 %v2751_v4 }
 0x2a6   : > { %4892 = vrcp.f32 %v2658_v58  ;;  %v2659_v45 = vadd.f32 1.0, %v4889_v31  ;;  %v3780_v41 = vmul.f32 -1.442695, %v2464_v60  ;;  %v2467_v33 = vadd.f32 %v5821_v34, %v2466_v43 }
 0x2a7   : > { %4894 = vrcp.f32 %v2661_v24  ;;  %v3783_v39 = vmul.f32 -1.442695, %v2475_v0 }
 0x2a8   : > { %4896 = vrcp.f32 %v2659_v45  ;;  %v3781_v59 = vmul.f32 -1.442695, %v2467_v33 }
 0x2a9   : > { %4898 = vpow2.f32 %v3782_v20 }
 0x2aa   : > { %4900 = vpow2.f32 %v3780_v41 }
 0x2ab   : > { %4902 = vpow2.f32 %v3783_v39 }
 0x2ac   : > { %4904 = vpow2.f32 %v3781_v59 }
 0x2af   : > { %v4891_v36 = vpop.eup %4890 }
 0x2b0   : > { %v4893_v5 = vpop.eup %4892 }
 0x2b1   : > { %v4895_v6 = vpop.eup %4894 }
 0x2b2   : > { %v4897_v38 = vpop.eup %4896  ;;  %v4349_v50 = vpop.f32.mrb[108].mxu1  ;;  %v2753_v42 = vpack.c.bf16 %v4895_v6, %v4891_v36 }
 0x2b3   : > { %v4899_v7 = vpop.eup %4898  ;;  %v2488_v63 = vadd.f32 %v4349_v50, %v5821_v34  ;;  %v2479_v12 = vpop.f32.mrb[109].mxu1  ;;  %v2752_v25 = vpack.c.bf16 %v4897_v38, %v4893_v5 }
 0x2b4   : > { %v4901_v55 = vpop.eup %4900  ;;  %v2664_v17 = vadd.f32 1.0, %v4899_v7  ;;  %v2480_v48 = vadd.f32 %v5821_v34, %v2479_v12  ;;  %v4350_v18 = vpop.f32.mrb[110].mxu1 }
 0x2b5   : > { %v4903_v2 = vpop.eup %4902  ;;  %v2662_v22 = vadd.f32 1.0, %v4901_v55  ;;  %v2491_v8 = vadd.f32 %v4350_v18, %v5821_v34  ;;  %4387 = vmatprep.mubr.bf16.mxu0 %v2752_v25  ;;  %v2482_v21 = vpop.f32.mrb[111].mxu1  ;;  %v3786_v15 = vmul.f32 -1.442695, %v2488_v63 }
 0x2b6   : > { %v4905_v46 = vpop.eup %4904  ;;  %4906 = vrcp.f32 %v2664_v17  ;;  %v2665_v10 = vadd.f32 1.0, %v4903_v2  ;;  %v2483_v26 = vadd.f32 %v5821_v34, %v2482_v21  ;;  %4388 = vmatmul.mubr.bf16.gmra.mrb[132].mxu0 %v2753_v42  ;;  %v3784_v37 = vmul.f32 -1.442695, %v2480_v48 }
 0x2b7   : > { %4908 = vrcp.f32 %v2662_v22  ;;  %v2663_v1 = vadd.f32 1.0, %v4905_v46  ;;  %v3787_v16 = vmul.f32 -1.442695, %v2491_v8 }
 0x2b8   : > { %4910 = vrcp.f32 %v2665_v10  ;;  %v3785_v9 = vmul.f32 -1.442695, %v2483_v26 }
 0x2b9   : > { %4912 = vrcp.f32 %v2663_v1 }
 0x2ba   : > { %4914 = vpow2.f32 %v3786_v15 }
 0x2bb   : > { %4916 = vpow2.f32 %v3784_v37 }
 0x2bc   : > { %4918 = vpow2.f32 %v3787_v16 }
 0x2bd   : > { %4920 = vpow2.f32 %v3785_v9 }
 0x2c0   : > { %v4907_v51 = vpop.eup %4906 }
 0x2c1   : > { %v4909_v23 = vpop.eup %4908 }
 0x2c2   : > { %v4911_v40 = vpop.eup %4910  ;;  %v4353_v57 = vpop.f32.mrb[112].mxu1 }
 0x2c3   : > { %v4913_v44 = vpop.eup %4912  ;;  %v2504_v62 = vadd.f32 %v4353_v57, %v5821_v34  ;;  %v2495_v19 = vpop.f32.mrb[113].mxu1  ;;  %v2755_v27 = vpack.c.bf16 %v4911_v40, %v4907_v51 }
 0x2c4   : > { %v4915_v61 = vpop.eup %4914  ;;  %v2496_v14 = vadd.f32 %v5821_v34, %v2495_v19  ;;  %v4354_v47 = vpop.f32.mrb[114].mxu1  ;;  %v2754_v29 = vpack.c.bf16 %v4913_v44, %v4909_v23 }
 0x2c5   : > { %v4917_v28 = vpop.eup %4916  ;;  %v2668_v49 = vadd.f32 1.0, %v4915_v61  ;;  %v2507_v3 = vadd.f32 %v4354_v47, %v5821_v34  ;;  %v2498_v4 = vpop.f32.mrb[115].mxu1  ;;  %v3790_v32 = vmul.f32 -1.442695, %v2504_v62 }
 0x2c6   : > { %v4919_v30 = vpop.eup %4918  ;;  %v2666_v53 = vadd.f32 1.0, %v4917_v28  ;;  %4391 = vmatprep.mubr.bf16.mxu0 %v2754_v29  ;;  %v2499_v54 = vadd.f32 %v5821_v34, %v2498_v4  ;;  %v3788_v11 = vmul.f32 -1.442695, %v2496_v14 }
 0x2c7   : > { %v4921_v52 = vpop.eup %4920  ;;  %4922 = vrcp.f32 %v2668_v49  ;;  %v2669_v13 = vadd.f32 1.0, %v4919_v30  ;;  %4392 = vmatmul.mubr.bf16.gmra.mrb[136].mxu0 %v2755_v27  ;;  %v3791_v58 = vmul.f32 -1.442695, %v2507_v3 }
 0x2c8   : > { %4924 = vrcp.f32 %v2666_v53  ;;  %v2667_v56 = vadd.f32 1.0, %v4921_v52  ;;  %v3789_v60 = vmul.f32 -1.442695, %v2499_v54 }
 0x2c9   : > { %4926 = vrcp.f32 %v2669_v13 }
 0x2ca   : > { %4928 = vrcp.f32 %v2667_v56 }
 0x2cb   : > { %4930 = vpow2.f32 %v3790_v32 }
 0x2cc   : > { %4932 = vpow2.f32 %v3788_v11 }
 0x2cd   : > { %4934 = vpow2.f32 %v3791_v58 }
 0x2ce   : > { %4936 = vpow2.f32 %v3789_v60 }
 0x2d1   : > { %v4923_v35 = vpop.eup %4922 }
 0x2d2   : > { %v4925_v31 = vpop.eup %4924  ;;  %v4357_v24 = vpop.f32.mrb[116].mxu1 }
 0x2d3   : > { %v4927_v20 = vpop.eup %4926  ;;  %v2520_v0 = vadd.f32 %v4357_v24, %v5821_v34  ;;  %v2511_v43 = vpop.f32.mrb[117].mxu1 }
 0x2d4   : > { %v4929_v45 = vpop.eup %4928  ;;  %v2512_v41 = vadd.f32 %v5821_v34, %v2511_v43  ;;  %v4358_v33 = vpop.f32.mrb[118].mxu1  ;;  %v2757_v39 = vpack.c.bf16 %v4927_v20, %v4923_v35 }
 0x2d5   : > { %v4931_v59 = vpop.eup %4930  ;;  %v3794_v36 = vmul.f32 -1.442695, %v2520_v0  ;;  %v2523_v5 = vadd.f32 %v4358_v33, %v5821_v34  ;;  %v2756_v6 = vpack.c.bf16 %v4929_v45, %v4925_v31  ;;  %v2514_v38 = vpop.f32.mrb[119].mxu1 }
 0x2d6   : > { %v4933_v50 = vpop.eup %4932  ;;  %v2672_v42 = vadd.f32 1.0, %v4931_v59  ;;  %v2515_v7 = vadd.f32 %v5821_v34, %v2514_v38  ;;  %v3792_v17 = vmul.f32 -1.442695, %v2512_v41 }
 0x2d7   : > { %v4935_v63 = vpop.eup %4934  ;;  %v2670_v12 = vadd.f32 1.0, %v4933_v50  ;;  %4938 = vpow2.f32 %v3794_v36  ;;  %4395 = vmatprep.mubr.bf16.mxu0 %v2756_v6  ;;  %v3795_v18 = vmul.f32 -1.442695, %v2523_v5  ;;  %v4730_v50 = vld [vmem:[%s6049_s7] sm:$0xff]  }
 0x2d8   : > { %v4937_v25 = vpop.eup %4936  ;;  %4940 = vrcp.f32 %v2672_v42  ;;  %v2673_v55 = vadd.f32 1.0, %v4935_v63  ;;  %4396 = vmatmul.mubr.bf16.gmra.mrb[140].mxu0 %v2757_v39  ;;  %v3793_v2 = vmul.f32 -1.442695, %v2515_v7  ;;  %4415 = vmatprep.subr.bf16.mxu1 %v4730_v50  ;;  %v4731_v63 = vld [vmem:[%s6049_s7 + $0x8] sm:$0xff]  }
 0x2d9   : > { %4942 = vrcp.f32 %v2670_v12  ;;  %v2671_v48 = vadd.f32 1.0, %v4937_v25  ;;  %4416 = vmatpush3.bf16.msra.mxu1 %v4730_v50 }
 0x2da   : > { %4944 = vrcp.f32 %v2673_v55  ;;  %4417 = vmatprep.subr.bf16.mxu1 %v4731_v63 }
 0x2db   : > { %4946 = vrcp.f32 %v2671_v48 }
 0x2dc   : > { %4948 = vpow2.f32 %v3792_v17 }
 0x2dd   : > { %4950 = vpow2.f32 %v3795_v18  ;;  %4418 = vmatpush3.bf16.msra.mxu1 %v4731_v63 }
 0x2de   : > { %4952 = vpow2.f32 %v3793_v2 }
 0x2e1   : > { %v4939_v22 = vpop.eup %4938 }
 0x2e2   : > { %v4941_v8 = vpop.eup %4940  ;;  %v2676_v21 = vadd.f32 1.0, %v4939_v22  ;;  %v4361_v46 = vpop.f32.mrb[120].mxu1 }
 0x2e3   : > { %v4943_v10 = vpop.eup %4942  ;;  %v2536_v15 = vadd.f32 %v4361_v46, %v5821_v34  ;;  %v2527_v26 = vpop.f32.mrb[121].mxu1 }
 0x2e4   : > { %v4945_v1 = vpop.eup %4944  ;;  %v2528_v37 = vadd.f32 %v5821_v34, %v2527_v26  ;;  %v4362_v16 = vpop.f32.mrb[122].mxu1  ;;  %4954 = vrcp.f32 %v2676_v21  ;;  %v4734_v26 = vld [vmem:[%s6049_s7 + $0x20] sm:$0xff]  }
 0x2e5   : > { %v4947_v9 = vpop.eup %4946  ;;  %v3798_v51 = vmul.f32 -1.442695, %v2536_v15  ;;  %v2539_v23 = vadd.f32 %v4362_v16, %v5821_v34  ;;  %v2530_v40 = vpop.f32.mrb[123].mxu1  ;;  %v2759_v57 = vpack.c.bf16 %v4945_v1, %v4941_v8  ;;  %v4732_v8 = vld [vmem:[%s6049_s7 + $0x10] sm:$0xff]   ;;  %v4733_v15 = vld [vmem:[%s6049_s7 + $0x18] sm:$0xff]   ;;  %v4735_v16 = vld [vmem:[%s6049_s7 + $0x28] sm:$0xff]  }
 0x2e6   : > { %v4949_v44 = vpop.eup %4948  ;;  %v3796_v62 = vmul.f32 -1.442695, %v2528_v37  ;;  %v2758_v19 = vpack.c.bf16 %v4947_v9, %v4943_v10  ;;  %v2531_v27 = vadd.f32 %v5821_v34, %v2530_v40  ;;  %4419 = vmatprep.subr.bf16.mxu1 %v4732_v8 }
 0x2e7   : > { %v4951_v61 = vpop.eup %4950  ;;  %v2674_v14 = vadd.f32 1.0, %v4949_v44  ;;  %4956 = vpow2.f32 %v3798_v51  ;;  %v3799_v28 = vmul.f32 -1.442695, %v2539_v23  ;;  %4420 = vmatpush3.bf16.msra.mxu1 %v4732_v8  ;;  %v4737_v44 = vld [vmem:[%s6049_s7 + $0x38] sm:$0xff]  }
 0x2e8   : > { %v4953_v47 = vpop.eup %4952  ;;  %v2677_v29 = vadd.f32 1.0, %v4951_v61  ;;  %4958 = vpow2.f32 %v3796_v62  ;;  %4399 = vmatprep.mubr.bf16.mxu0 %v2758_v19  ;;  %v3797_v3 = vmul.f32 -1.442695, %v2531_v27  ;;  %4421 = vmatprep.subr.bf16.mxu1 %v4733_v15  ;;  %v5882_v62 = vld [vmem:[%s6048_s6] ss:$0 sm:$0xff] }
 0x2e9   : > { %4960 = vrcp.f32 %v2674_v14  ;;  %v2675_v49 = vadd.f32 1.0, %v4953_v47  ;;  %4400 = vmatmul.mubr.bf16.gmra.mrb[144].mxu0 %v2759_v57  ;;  %v4736_v57 = vld [vmem:[%s6049_s7 + $0x30] sm:$0xff]  }
 0x2ea   : > { %4962 = vrcp.f32 %v2677_v29 }
 0x2eb   : > { %4964 = vrcp.f32 %v2675_v49  ;;  %4422 = vmatpush3.bf16.msra.mxu1 %v4733_v15 }
 0x2ec   : > { %4966 = vpow2.f32 %v3799_v28  ;;  %4423 = vmatprep.subr.bf16.mxu1 %v4734_v26 }
 0x2ed   : > { %4968 = vpow2.f32 %v3797_v3 }
 0x2ee   : > { %v4955_v4 = vpop.eup %4954 }
 0x2ef   : > { %4424 = vmatpush3.bf16.msra.mxu1 %v4734_v26 }
 0x2f0   : > { %4425 = vmatprep.subr.bf16.mxu1 %v4735_v16 }
 0x2f1   : > { %v4957_v30 = vpop.eup %4956 }
 0x2f2   : > { %v4959_v53 = vpop.eup %4958  ;;  %v2680_v54 = vadd.f32 1.0, %v4957_v30  ;;  %v4365_v52 = vpop.f32.mrb[124].mxu1 }
 0x2f3   : > { %v4961_v13 = vpop.eup %4960  ;;  %v2678_v32 = vadd.f32 1.0, %v4959_v53  ;;  %v2552_v56 = vadd.f32 %v4365_v52, %v5821_v34  ;;  %v2543_v11 = vpop.f32.mrb[125].mxu1  ;;  %4426 = vmatpush3.bf16.msra.mxu1 %v4735_v16 }
 0x2f4   : > { %v4963_v58 = vpop.eup %4962  ;;  %v2544_v60 = vadd.f32 %v5821_v34, %v2543_v11  ;;  %v4366_v35 = vpop.f32.mrb[126].mxu1  ;;  %4970 = vrcp.f32 %v2680_v54  ;;  %4427 = vmatprep.subr.bf16.mxu1 %v4736_v57 }
 0x2f5   : > { %v4965_v31 = vpop.eup %4964  ;;  %v3802_v24 = vmul.f32 -1.442695, %v2552_v56  ;;  %v2555_v20 = vadd.f32 %v4366_v35, %v5821_v34  ;;  %v2546_v0 = vpop.f32.mrb[127].mxu1  ;;  %v2761_v43 = vpack.c.bf16 %v4963_v58, %v4955_v4  ;;  %4972 = vrcp.f32 %v2678_v32 }
 0x2f6   : > { %v4967_v45 = vpop.eup %4966  ;;  %v3800_v41 = vmul.f32 -1.442695, %v2544_v60  ;;  %v2760_v33 = vpack.c.bf16 %v4965_v31, %v4961_v13  ;;  %v2547_v39 = vadd.f32 %v5821_v34, %v2546_v0 }
 0x2f7   : > { %v4969_v59 = vpop.eup %4968  ;;  %v2681_v36 = vadd.f32 1.0, %v4967_v45  ;;  %4974 = vpow2.f32 %v3802_v24  ;;  %v3803_v5 = vmul.f32 -1.442695, %v2555_v20  ;;  %4428 = vmatpush3.bf16.msra.mxu1 %v4736_v57 }
 0x2f8   : > { %v2679_v6 = vadd.f32 1.0, %v4969_v59  ;;  %4976 = vpow2.f32 %v3800_v41  ;;  %4403 = vmatprep.mubr.bf16.mxu0 %v2760_v33  ;;  %v3801_v38 = vmul.f32 -1.442695, %v2547_v39  ;;  %4429 = vmatprep.subr.bf16.mxu1 %v4737_v44 }
 0x2f9   : > { %4978 = vrcp.f32 %v2681_v36  ;;  %4404 = vmatmul.mubr.bf16.gmra.mrb[148].mxu0 %v2761_v43 }
 0x2fa   : > { %4980 = vrcp.f32 %v2679_v6 }
 0x2fb   : > { %4982 = vpow2.f32 %v3803_v5  ;;  %4430 = vmatpush3.bf16.msra.mxu1 %v4737_v44 }
 0x2fc   : > { %4984 = vpow2.f32 %v3801_v38 }
 0x2fe   : > { %v4971_v42 = vpop.eup %4970 }
 0x2ff   : > { %v4973_v34 = vpop.eup %4972 }
 0x301   : > { %v4975_v7 = vpop.eup %4974 }
 0x302   : > { %v4977_v12 = vpop.eup %4976  ;;  %v2684_v25 = vadd.f32 1.0, %v4975_v7 }
 0x303   : > { %v4979_v55 = vpop.eup %4978  ;;  %v2682_v17 = vadd.f32 1.0, %v4977_v12 }
 0x304   : > { %v4981_v48 = vpop.eup %4980  ;;  %v2763_v18 = vpack.c.bf16 %v4979_v55, %v4971_v42  ;;  %4986 = vrcp.f32 %v2684_v25 }
 0x305   : > { %v4983_v2 = vpop.eup %4982  ;;  %v2762_v22 = vpack.c.bf16 %v4981_v48, %v4973_v34  ;;  %4988 = vrcp.f32 %v2682_v17 }
 0x306   : > { %v4985_v21 = vpop.eup %4984  ;;  %v2685_v46 = vadd.f32 1.0, %v4983_v2 }
 0x307   : > { %v2683_v10 = vadd.f32 1.0, %v4985_v21  ;;  %4407 = vmatprep.mubr.bf16.mxu0 %v2762_v22 }
 0x308   : > { %4990 = vrcp.f32 %v2685_v46  ;;  %4408 = vmatmul.mubr.bf16.gmra.mrb[152].mxu0 %v2763_v18 }
 0x309   : > { %4992 = vrcp.f32 %v2683_v10 }
 0x30e   : > { %v4987_v1 = vpop.eup %4986 }
 0x30f   : > { %v4989_v37 = vpop.eup %4988 }
 0x312   : > { %v4991_v9 = vpop.eup %4990 }
 0x313   : > { %v4993_v51 = vpop.eup %4992  ;;  %v2765_v23 = vpack.c.bf16 %v4991_v9, %v4987_v1 }
 0x314   : > { %v2764_v40 = vpack.c.bf16 %v4993_v51, %v4989_v37 }
 0x316   : > { %4411 = vmatprep.mubr.bf16.mxu0 %v2764_v40 }
 0x317   : > { %4412 = vmatmul.mubr.bf16.gmra.mrb[156].mxu0 %v2765_v23 }
 0x378   : > { %v4385_v19 = vpop.f32.mrb[128].mxu0 }
 0x379   : > { %v2880_v27 = vadd.f32 %v4385_v19, %v5882_v62  ;;  %v2871_v61 = vpop.f32.mrb[129].mxu0 }
 0x37a   : > { %v2872_v14 = vadd.f32 %v5882_v62, %v2871_v61  ;;  %v4386_v47 = vpop.f32.mrb[130].mxu0 }
 0x37b   : > { %v3815_v29 = vmul.f32 -1.442695, %v2880_v27  ;;  %v2883_v28 = vadd.f32 %v4386_v47, %v5882_v62  ;;  %v2874_v49 = vpop.f32.mrb[131].mxu0 }
 0x37c   : > { %v3813_v3 = vmul.f32 -1.442695, %v2872_v14  ;;  %v2875_v4 = vadd.f32 %v5882_v62, %v2874_v49 }
 0x37d   : > { %4994 = vpow2.f32 %v3815_v29  ;;  %v3816_v30 = vmul.f32 -1.442695, %v2883_v28 }
 0x37e   : > { %4996 = vpow2.f32 %v3813_v3  ;;  %v3814_v53 = vmul.f32 -1.442695, %v2875_v4 }
 0x37f   : > { %4998 = vpow2.f32 %v3816_v30 }
 0x380   : > { %5000 = vpow2.f32 %v3814_v53 }
 0x387   : > { %v4995_v54 = vpop.eup %4994 }
 0x388   : > { %v4997_v52 = vpop.eup %4996  ;;  %v3096_v13 = vadd.f32 1.0, %v4995_v54 }
 0x389   : > { %v4999_v32 = vpop.eup %4998  ;;  %v3094_v56 = vadd.f32 1.0, %v4997_v52  ;;  %v4389_v11 = vpop.f32.mrb[132].mxu0 }
 0x38a   : > { %v5001_v58 = vpop.eup %5000  ;;  %5002 = vrcp.f32 %v3096_v13  ;;  %v3097_v60 = vadd.f32 1.0, %v4999_v32  ;;  %v2896_v35 = vadd.f32 %v4389_v11, %v5882_v62  ;;  %v2887_v31 = vpop.f32.mrb[133].mxu0 }
 0x38b   : > { %5004 = vrcp.f32 %v3094_v56  ;;  %v3095_v24 = vadd.f32 1.0, %v5001_v58  ;;  %v2888_v20 = vadd.f32 %v5882_v62, %v2887_v31  ;;  %v4390_v0 = vpop.f32.mrb[134].mxu0 }
 0x38c   : > { %5006 = vrcp.f32 %v3097_v60  ;;  %v3819_v43 = vmul.f32 -1.442695, %v2896_v35  ;;  %v2899_v45 = vadd.f32 %v4390_v0, %v5882_v62  ;;  %v2890_v41 = vpop.f32.mrb[135].mxu0 }
 0x38d   : > { %5008 = vrcp.f32 %v3095_v24  ;;  %v3817_v33 = vmul.f32 -1.442695, %v2888_v20  ;;  %v2891_v39 = vadd.f32 %v5882_v62, %v2890_v41 }
 0x38e   : > { %5010 = vpow2.f32 %v3819_v43  ;;  %v3820_v59 = vmul.f32 -1.442695, %v2899_v45 }
 0x38f   : > { %5012 = vpow2.f32 %v3817_v33  ;;  %v3818_v36 = vmul.f32 -1.442695, %v2891_v39 }
 0x390   : > { %5014 = vpow2.f32 %v3820_v59 }
 0x391   : > { %5016 = vpow2.f32 %v3818_v36 }
 0x394   : > { %v5003_v5 = vpop.eup %5002 }
 0x395   : > { %v5005_v6 = vpop.eup %5004 }
 0x396   : > { %v5007_v38 = vpop.eup %5006 }
 0x397   : > { %v5009_v50 = vpop.eup %5008  ;;  %v3191_v42 = vpack.c.bf16 %v5007_v38, %v5003_v5 }
 0x398   : > { %v5011_v34 = vpop.eup %5010  ;;  %v3190_v7 = vpack.c.bf16 %v5009_v50, %v5005_v6 }
 0x399   : > { %v5013_v63 = vpop.eup %5012  ;;  %v3100_v12 = vadd.f32 1.0, %v5011_v34 }
 0x39a   : > { %v5015_v25 = vpop.eup %5014  ;;  %v3098_v55 = vadd.f32 1.0, %v5013_v63  ;;  %v4393_v17 = vpop.f32.mrb[136].mxu0  ;;  %4431 = vmatprep.mubr.bf16.mxu1 %v3190_v7 }
 0x39b   : > { %v5017_v48 = vpop.eup %5016  ;;  %5018 = vrcp.f32 %v3100_v12  ;;  %v3101_v18 = vadd.f32 1.0, %v5015_v25  ;;  %v2912_v2 = vadd.f32 %v4393_v17, %v5882_v62  ;;  %v2903_v22 = vpop.f32.mrb[137].mxu0  ;;  %4432 = vmatmul.mubr.bf16.vlgmr.msra.gmra.mrb[128].mxu1 %v3191_v42 }
 0x39c   : > { %5020 = vrcp.f32 %v3098_v55  ;;  %v3099_v8 = vadd.f32 1.0, %v5017_v48  ;;  %v2904_v21 = vadd.f32 %v5882_v62, %v2903_v22  ;;  %v4394_v46 = vpop.f32.mrb[138].mxu0 }
 0x39d   : > { %5022 = vrcp.f32 %v3101_v18  ;;  %v3823_v10 = vmul.f32 -1.442695, %v2912_v2  ;;  %v2915_v15 = vadd.f32 %v4394_v46, %v5882_v62  ;;  %v2906_v26 = vpop.f32.mrb[139].mxu0 }
 0x39e   : > { %5024 = vrcp.f32 %v3099_v8  ;;  %v3821_v1 = vmul.f32 -1.442695, %v2904_v21  ;;  %v2907_v37 = vadd.f32 %v5882_v62, %v2906_v26 }
 0x39f   : > { %5026 = vpow2.f32 %v3823_v10  ;;  %v3824_v16 = vmul.f32 -1.442695, %v2915_v15 }
 0x3a0   : > { %5028 = vpow2.f32 %v3821_v1  ;;  %v3822_v9 = vmul.f32 -1.442695, %v2907_v37 }
 0x3a1   : > { %5030 = vpow2.f32 %v3824_v16 }
 0x3a2   : > { %5032 = vpow2.f32 %v3822_v9 }
 0x3a5   : > { %v5019_v51 = vpop.eup %5018 }
 0x3a6   : > { %v5021_v23 = vpop.eup %5020 }
 0x3a7   : > { %v5023_v40 = vpop.eup %5022 }
 0x3a8   : > { %v5025_v57 = vpop.eup %5024  ;;  %v3193_v44 = vpack.c.bf16 %v5023_v40, %v5019_v51 }
 0x3a9   : > { %v5027_v19 = vpop.eup %5026  ;;  %v3192_v27 = vpack.c.bf16 %v5025_v57, %v5021_v23 }
 0x3aa   : > { %v5029_v61 = vpop.eup %5028  ;;  %v3104_v14 = vadd.f32 1.0, %v5027_v19 }
 0x3ab   : > { %v5031_v47 = vpop.eup %5030  ;;  %v3102_v29 = vadd.f32 1.0, %v5029_v61  ;;  %v4397_v28 = vpop.f32.mrb[140].mxu0  ;;  %4435 = vmatprep.mubr.bf16.mxu1 %v3192_v27 }
 0x3ac   : > { %v5033_v49 = vpop.eup %5032  ;;  %5034 = vrcp.f32 %v3104_v14  ;;  %v3105_v3 = vadd.f32 1.0, %v5031_v47  ;;  %v2928_v4 = vadd.f32 %v4397_v28, %v5882_v62  ;;  %v2919_v30 = vpop.f32.mrb[141].mxu0  ;;  %4436 = vmatmul.mubr.bf16.gmra.mrb[132].mxu1 %v3193_v44 }
 0x3ad   : > { %5036 = vrcp.f32 %v3102_v29  ;;  %v3103_v53 = vadd.f32 1.0, %v5033_v49  ;;  %v2920_v54 = vadd.f32 %v5882_v62, %v2919_v30  ;;  %v4398_v52 = vpop.f32.mrb[142].mxu0 }
 0x3ae   : > { %5038 = vrcp.f32 %v3105_v3  ;;  %v3827_v13 = vmul.f32 -1.442695, %v2928_v4  ;;  %v2931_v32 = vadd.f32 %v4398_v52, %v5882_v62  ;;  %v2922_v56 = vpop.f32.mrb[143].mxu0 }
 0x3af   : > { %5040 = vrcp.f32 %v3103_v53  ;;  %v3825_v11 = vmul.f32 -1.442695, %v2920_v54  ;;  %v2923_v58 = vadd.f32 %v5882_v62, %v2922_v56 }
 0x3b0   : > { %5042 = vpow2.f32 %v3827_v13  ;;  %v3828_v60 = vmul.f32 -1.442695, %v2931_v32 }
 0x3b1   : > { %5044 = vpow2.f32 %v3825_v11  ;;  %v3826_v35 = vmul.f32 -1.442695, %v2923_v58 }
 0x3b2   : > { %5046 = vpow2.f32 %v3828_v60 }
 0x3b3   : > { %5048 = vpow2.f32 %v3826_v35 }
 0x3b6   : > { %v5035_v31 = vpop.eup %5034 }
 0x3b7   : > { %v5037_v24 = vpop.eup %5036 }
 0x3b8   : > { %v5039_v20 = vpop.eup %5038 }
 0x3b9   : > { %v5041_v0 = vpop.eup %5040  ;;  %v3195_v43 = vpack.c.bf16 %v5039_v20, %v5035_v31 }
 0x3ba   : > { %v5043_v45 = vpop.eup %5042  ;;  %v3194_v41 = vpack.c.bf16 %v5041_v0, %v5037_v24 }
 0x3bb   : > { %v5045_v33 = vpop.eup %5044  ;;  %v3108_v39 = vadd.f32 1.0, %v5043_v45 }
 0x3bc   : > { %v5047_v59 = vpop.eup %5046  ;;  %v3106_v36 = vadd.f32 1.0, %v5045_v33  ;;  %v4401_v5 = vpop.f32.mrb[144].mxu0  ;;  %4439 = vmatprep.mubr.bf16.mxu1 %v3194_v41 }
 0x3bd   : > { %v5049_v6 = vpop.eup %5048  ;;  %5050 = vrcp.f32 %v3108_v39  ;;  %v3109_v38 = vadd.f32 1.0, %v5047_v59  ;;  %v2944_v50 = vadd.f32 %v4401_v5, %v5882_v62  ;;  %v2935_v42 = vpop.f32.mrb[145].mxu0  ;;  %4440 = vmatmul.mubr.bf16.gmra.mrb[136].mxu1 %v3195_v43 }
 0x3be   : > { %5052 = vrcp.f32 %v3106_v36  ;;  %v3107_v34 = vadd.f32 1.0, %v5049_v6  ;;  %v2936_v7 = vadd.f32 %v5882_v62, %v2935_v42  ;;  %v4402_v63 = vpop.f32.mrb[146].mxu0 }
 0x3bf   : > { %5054 = vrcp.f32 %v3109_v38  ;;  %v3831_v12 = vmul.f32 -1.442695, %v2944_v50  ;;  %v2947_v25 = vadd.f32 %v4402_v63, %v5882_v62  ;;  %v2938_v55 = vpop.f32.mrb[147].mxu0 }
 0x3c0   : > { %5056 = vrcp.f32 %v3107_v34  ;;  %v3829_v17 = vmul.f32 -1.442695, %v2936_v7  ;;  %v2939_v48 = vadd.f32 %v5882_v62, %v2938_v55 }
 0x3c1   : > { %5058 = vpow2.f32 %v3831_v12  ;;  %v3832_v18 = vmul.f32 -1.442695, %v2947_v25 }
 0x3c2   : > { %5060 = vpow2.f32 %v3829_v17  ;;  %v3830_v2 = vmul.f32 -1.442695, %v2939_v48 }
 0x3c3   : > { %5062 = vpow2.f32 %v3832_v18 }
 0x3c4   : > { %5064 = vpow2.f32 %v3830_v2 }
 0x3c7   : > { %v5051_v22 = vpop.eup %5050 }
 0x3c8   : > { %v5053_v8 = vpop.eup %5052 }
 0x3c9   : > { %v5055_v21 = vpop.eup %5054 }
 0x3ca   : > { %v5057_v46 = vpop.eup %5056  ;;  %v3197_v10 = vpack.c.bf16 %v5055_v21, %v5051_v22 }
 0x3cb   : > { %v5059_v15 = vpop.eup %5058  ;;  %v3196_v26 = vpack.c.bf16 %v5057_v46, %v5053_v8 }
 0x3cc   : > { %v5061_v1 = vpop.eup %5060  ;;  %v3112_v37 = vadd.f32 1.0, %v5059_v15  ;;  %v4405_v16 = vpop.f32.mrb[148].mxu0 }
 0x3cd   : > { %v5063_v9 = vpop.eup %5062  ;;  %v3110_v51 = vadd.f32 1.0, %v5061_v1  ;;  %v2960_v23 = vadd.f32 %v4405_v16, %v5882_v62  ;;  %v2951_v40 = vpop.f32.mrb[149].mxu0  ;;  %4443 = vmatprep.mubr.bf16.mxu1 %v3196_v26 }
 0x3ce   : > { %v5065_v57 = vpop.eup %5064  ;;  %5066 = vrcp.f32 %v3112_v37  ;;  %v3113_v44 = vadd.f32 1.0, %v5063_v9  ;;  %v2952_v19 = vadd.f32 %v5882_v62, %v2951_v40  ;;  %v4406_v27 = vpop.f32.mrb[150].mxu0  ;;  %4444 = vmatmul.mubr.bf16.gmra.mrb[140].mxu1 %v3197_v10 }
 0x3cf   : > { %5068 = vrcp.f32 %v3110_v51  ;;  %v3111_v61 = vadd.f32 1.0, %v5065_v57  ;;  %v3835_v14 = vmul.f32 -1.442695, %v2960_v23  ;;  %v2963_v47 = vadd.f32 %v4406_v27, %v5882_v62  ;;  %v2954_v29 = vpop.f32.mrb[151].mxu0 }
 0x3d0   : > { %5070 = vrcp.f32 %v3113_v44  ;;  %v3833_v28 = vmul.f32 -1.442695, %v2952_v19  ;;  %v2955_v49 = vadd.f32 %v5882_v62, %v2954_v29 }
 0x3d1   : > { %5072 = vrcp.f32 %v3111_v61  ;;  %v3836_v3 = vmul.f32 -1.442695, %v2963_v47 }
 0x3d2   : > { %5074 = vpow2.f32 %v3835_v14  ;;  %v3834_v4 = vmul.f32 -1.442695, %v2955_v49 }
 0x3d3   : > { %5076 = vpow2.f32 %v3833_v28 }
 0x3d4   : > { %5078 = vpow2.f32 %v3836_v3 }
 0x3d5   : > { %5080 = vpow2.f32 %v3834_v4 }
 0x3d8   : > { %v5067_v30 = vpop.eup %5066 }
 0x3d9   : > { %v5069_v53 = vpop.eup %5068 }
 0x3da   : > { %v5071_v54 = vpop.eup %5070 }
 0x3db   : > { %v5073_v52 = vpop.eup %5072  ;;  %v4409_v13 = vpop.f32.mrb[152].mxu0  ;;  %v3199_v32 = vpack.c.bf16 %v5071_v54, %v5067_v30 }
 0x3dc   : > { %v5075_v56 = vpop.eup %5074  ;;  %v2976_v11 = vadd.f32 %v4409_v13, %v5882_v62  ;;  %v2967_v58 = vpop.f32.mrb[153].mxu0  ;;  %v3198_v60 = vpack.c.bf16 %v5073_v52, %v5069_v53 }
 0x3dd   : > { %v5077_v35 = vpop.eup %5076  ;;  %v3116_v31 = vadd.f32 1.0, %v5075_v56  ;;  %v2968_v24 = vadd.f32 %v5882_v62, %v2967_v58  ;;  %v4410_v20 = vpop.f32.mrb[154].mxu0  ;;  %v5922_v58 = vld [vmem:[%s6050_s8] ss:$0 sm:$0xff] }
 0x3de   : > { %v5079_v0 = vpop.eup %5078  ;;  %v3114_v43 = vadd.f32 1.0, %v5077_v35  ;;  %v2979_v45 = vadd.f32 %v4410_v20, %v5882_v62  ;;  %4447 = vmatprep.mubr.bf16.mxu1 %v3198_v60  ;;  %v2970_v41 = vpop.f32.mrb[155].mxu0  ;;  %v3839_v59 = vmul.f32 -1.442695, %v2976_v11 }
 0x3df   : > { %v5081_v33 = vpop.eup %5080  ;;  %5082 = vrcp.f32 %v3116_v31  ;;  %v3117_v39 = vadd.f32 1.0, %v5079_v0  ;;  %v2971_v36 = vadd.f32 %v5882_v62, %v2970_v41  ;;  %4448 = vmatmul.mubr.bf16.gmra.mrb[144].mxu1 %v3199_v32  ;;  %v3837_v6 = vmul.f32 -1.442695, %v2968_v24 }
 0x3e0   : > { %5084 = vrcp.f32 %v3114_v43  ;;  %v3115_v5 = vadd.f32 1.0, %v5081_v33  ;;  %v3840_v38 = vmul.f32 -1.442695, %v2979_v45 }
 0x3e1   : > { %5086 = vrcp.f32 %v3117_v39  ;;  %v3838_v50 = vmul.f32 -1.442695, %v2971_v36 }
 0x3e2   : > { %5088 = vrcp.f32 %v3115_v5 }
 0x3e3   : > { %5090 = vpow2.f32 %v3839_v59 }
 0x3e4   : > { %5092 = vpow2.f32 %v3837_v6 }
 0x3e5   : > { %5094 = vpow2.f32 %v3840_v38 }
 0x3e6   : > { %5096 = vpow2.f32 %v3838_v50 }
 0x3e9   : > { %v5083_v42 = vpop.eup %5082 }
 0x3ea   : > { %v5085_v34 = vpop.eup %5084  ;;  %v4413_v7 = vpop.f32.mrb[156].mxu0 }
 0x3eb   : > { %v5087_v63 = vpop.eup %5086  ;;  %v2992_v12 = vadd.f32 %v4413_v7, %v5882_v62  ;;  %v2983_v25 = vpop.f32.mrb[157].mxu0 }
 0x3ec   : > { %v5089_v55 = vpop.eup %5088  ;;  %v2984_v17 = vadd.f32 %v5882_v62, %v2983_v25  ;;  %v4414_v48 = vpop.f32.mrb[158].mxu0  ;;  %v3201_v18 = vpack.c.bf16 %v5087_v63, %v5083_v42 }
 0x3ed   : > { %v5091_v2 = vpop.eup %5090  ;;  %v3843_v22 = vmul.f32 -1.442695, %v2992_v12  ;;  %v2995_v8 = vadd.f32 %v4414_v48, %v5882_v62  ;;  %v3200_v21 = vpack.c.bf16 %v5089_v55, %v5085_v34  ;;  %v2986_v46 = vpop.f32.mrb[159].mxu0 }
 0x3ee   : > { %v5093_v10 = vpop.eup %5092  ;;  %v3120_v15 = vadd.f32 1.0, %v5091_v2  ;;  %v2987_v26 = vadd.f32 %v5882_v62, %v2986_v46  ;;  %v3841_v51 = vmul.f32 -1.442695, %v2984_v17 }
 0x3ef   : > { %v5095_v1 = vpop.eup %5094  ;;  %v3118_v37 = vadd.f32 1.0, %v5093_v10  ;;  %5098 = vpow2.f32 %v3843_v22  ;;  %4451 = vmatprep.mubr.bf16.mxu1 %v3200_v21  ;;  %v3844_v40 = vmul.f32 -1.442695, %v2995_v8 }
 0x3f0   : > { %v5097_v16 = vpop.eup %5096  ;;  %5100 = vrcp.f32 %v3120_v15  ;;  %v3121_v9 = vadd.f32 1.0, %v5095_v1  ;;  %4452 = vmatmul.mubr.bf16.gmra.mrb[148].mxu1 %v3201_v18  ;;  %v3842_v57 = vmul.f32 -1.442695, %v2987_v26 }
 0x3f1   : > { %5102 = vrcp.f32 %v3118_v37  ;;  %v3119_v23 = vadd.f32 1.0, %v5097_v16 }
 0x3f2   : > { %5104 = vrcp.f32 %v3121_v9 }
 0x3f3   : > { %5106 = vrcp.f32 %v3119_v23 }
 0x3f4   : > { %5108 = vpow2.f32 %v3841_v51 }
 0x3f5   : > { %5110 = vpow2.f32 %v3844_v40 }
 0x3f6   : > { %5112 = vpow2.f32 %v3842_v57 }
 0x3f9   : > { %v5099_v44 = vpop.eup %5098 }
 0x3fa   : > { %v5101_v62 = vpop.eup %5100  ;;  %v3124_v61 = vadd.f32 1.0, %v5099_v44 }
 0x3fb   : > { %v5103_v19 = vpop.eup %5102 }
 0x3fc   : > { %v5105_v27 = vpop.eup %5104  ;;  %5114 = vrcp.f32 %v3124_v61 }
 0x3fd   : > { %v5107_v14 = vpop.eup %5106  ;;  %v3203_v47 = vpack.c.bf16 %v5105_v27, %v5101_v62 }
 0x3fe   : > { %v5109_v29 = vpop.eup %5108  ;;  %v3202_v28 = vpack.c.bf16 %v5107_v14, %v5103_v19 }
 0x3ff   : > { %v5111_v49 = vpop.eup %5110  ;;  %v3122_v3 = vadd.f32 1.0, %v5109_v29 }
 0x400   : > { %v5113_v4 = vpop.eup %5112  ;;  %v3125_v30 = vadd.f32 1.0, %v5111_v49  ;;  %4455 = vmatprep.mubr.bf16.mxu1 %v3202_v28 }
 0x401   : > { %5116 = vrcp.f32 %v3122_v3  ;;  %v3123_v53 = vadd.f32 1.0, %v5113_v4  ;;  %4456 = vmatmul.mubr.bf16.gmra.mrb[152].mxu1 %v3203_v47 }
 0x402   : > { %5118 = vrcp.f32 %v3125_v30 }
 0x403   : > { %5120 = vrcp.f32 %v3123_v53 }
 0x406   : > { %v5115_v54 = vpop.eup %5114 }
 0x40b   : > { %v5117_v52 = vpop.eup %5116 }
 0x40c   : > { %v5119_v13 = vpop.eup %5118 }
 0x40d   : > { %v5121_v32 = vpop.eup %5120  ;;  %v3205_v56 = vpack.c.bf16 %v5119_v13, %v5115_v54 }
 0x40e   : > { %v3204_v11 = vpack.c.bf16 %v5121_v32, %v5117_v52 }
 0x410   : > { %4459 = vmatprep.mubr.bf16.mxu1 %v3204_v11 }
 0x411   : > { %4460 = vmatmul.mubr.bf16.gmra.mrb[156].mxu1 %v3205_v56 }
 0x46e   : > { %v4433_v60 = vpop.f32.mrb[128].mxu1 }
 0x46f   : > { %v3320_v35 = vadd.f32 %v4433_v60, %v5922_v58  ;;  %v3311_v31 = vpop.f32.mrb[129].mxu1 }
 0x470   : > { %v3312_v24 = vadd.f32 %v5922_v58, %v3311_v31  ;;  %v4434_v20 = vpop.f32.mrb[130].mxu1 }
 0x471   : > { %3440 = vst [vmem:[%s5926_s17 + $0x10] sm:$0xff] %v3320_v35  ;;  %v3323_v0 = vadd.f32 %v4434_v20, %v5922_v58  ;;  %v3314_v43 = vpop.f32.mrb[131].mxu1 }
 0x472   : > { %3438 = vst [vmem:[%s5926_s17] sm:$0xff] %v3312_v24  ;;  %v3315_v45 = vadd.f32 %v5922_v58, %v3314_v43 }
 0x473   : > { %3441 = vst [vmem:[%s5926_s17 + $0x18] sm:$0xff] %v3323_v0 }
 0x474   : > { %3439 = vst [vmem:[%s5926_s17 + $0x8] sm:$0xff] %v3315_v45 }
 0x47f   : > { %v4437_v41 = vpop.f32.mrb[132].mxu1 }
 0x480   : > { %v3336_v33 = vadd.f32 %v4437_v41, %v5922_v58  ;;  %v3327_v39 = vpop.f32.mrb[133].mxu1 }
 0x481   : > { %v3328_v59 = vadd.f32 %v5922_v58, %v3327_v39  ;;  %v4438_v36 = vpop.f32.mrb[134].mxu1 }
 0x482   : > { %3444 = vst [vmem:[%s5926_s17 + $0x30] sm:$0xff] %v3336_v33  ;;  %v3339_v5 = vadd.f32 %v4438_v36, %v5922_v58  ;;  %v3330_v6 = vpop.f32.mrb[135].mxu1 }
 0x483   : > { %3442 = vst [vmem:[%s5926_s17 + $0x20] sm:$0xff] %v3328_v59  ;;  %v3331_v38 = vadd.f32 %v5922_v58, %v3330_v6 }
 0x484   : > { %3445 = vst [vmem:[%s5926_s17 + $0x38] sm:$0xff] %v3339_v5 }
 0x485   : > { %3443 = vst [vmem:[%s5926_s17 + $0x28] sm:$0xff] %v3331_v38 }
 0x490   : > { %v4441_v50 = vpop.f32.mrb[136].mxu1 }
 0x491   : > { %v3352_v42 = vadd.f32 %v4441_v50, %v5922_v58  ;;  %v3343_v34 = vpop.f32.mrb[137].mxu1 }
 0x492   : > { %v3344_v7 = vadd.f32 %v5922_v58, %v3343_v34  ;;  %v4442_v63 = vpop.f32.mrb[138].mxu1 }
 0x493   : > { %3448 = vst [vmem:[%s5926_s17 + $0x50] sm:$0xff] %v3352_v42  ;;  %v3355_v12 = vadd.f32 %v4442_v63, %v5922_v58  ;;  %v3346_v25 = vpop.f32.mrb[139].mxu1 }
 0x494   : > { %3446 = vst [vmem:[%s5926_s17 + $0x40] sm:$0xff] %v3344_v7  ;;  %v3347_v55 = vadd.f32 %v5922_v58, %v3346_v25 }
 0x495   : > { %3449 = vst [vmem:[%s5926_s17 + $0x58] sm:$0xff] %v3355_v12 }
 0x496   : > { %3447 = vst [vmem:[%s5926_s17 + $0x48] sm:$0xff] %v3347_v55 }
 0x4a1   : > { %v4445_v17 = vpop.f32.mrb[140].mxu1 }
 0x4a2   : > { %v3368_v48 = vadd.f32 %v4445_v17, %v5922_v58  ;;  %v3359_v18 = vpop.f32.mrb[141].mxu1 }
 0x4a3   : > { %v3360_v2 = vadd.f32 %v5922_v58, %v3359_v18  ;;  %v4446_v22 = vpop.f32.mrb[142].mxu1 }
 0x4a4   : > { %3452 = vst [vmem:[%s5926_s17 + $0x70] sm:$0xff] %v3368_v48  ;;  %v3371_v8 = vadd.f32 %v4446_v22, %v5922_v58  ;;  %v3362_v21 = vpop.f32.mrb[143].mxu1 }
 0x4a5   : > { %3450 = vst [vmem:[%s5926_s17 + $0x60] sm:$0xff] %v3360_v2  ;;  %v3363_v46 = vadd.f32 %v5922_v58, %v3362_v21 }
 0x4a6   : > { %3453 = vst [vmem:[%s5926_s17 + $0x78] sm:$0xff] %v3371_v8 }
 0x4a7   : > { %3451 = vst [vmem:[%s5926_s17 + $0x68] sm:$0xff] %v3363_v46 }
 0x4b2   : > { %v4449_v10 = vpop.f32.mrb[144].mxu1 }
 0x4b3   : > { %v3384_v15 = vadd.f32 %v4449_v10, %v5922_v58  ;;  %v3375_v26 = vpop.f32.mrb[145].mxu1 }
 0x4b4   : > { %v3376_v1 = vadd.f32 %v5922_v58, %v3375_v26  ;;  %v4450_v37 = vpop.f32.mrb[146].mxu1 }
 0x4b5   : > { %3456 = vst [vmem:[%s5926_s17 + $0x90] sm:$0xff] %v3384_v15  ;;  %v3387_v16 = vadd.f32 %v4450_v37, %v5922_v58  ;;  %v3378_v9 = vpop.f32.mrb[147].mxu1 }
 0x4b6   : > { %3454 = vst [vmem:[%s5926_s17 + $0x80] sm:$0xff] %v3376_v1  ;;  %v3379_v51 = vadd.f32 %v5922_v58, %v3378_v9 }
 0x4b7   : > { %3457 = vst [vmem:[%s5926_s17 + $0x98] sm:$0xff] %v3387_v16 }
 0x4b8   : > { %3455 = vst [vmem:[%s5926_s17 + $0x88] sm:$0xff] %v3379_v51 }
 0x4c3   : > { %v4453_v23 = vpop.f32.mrb[148].mxu1 }
 0x4c4   : > { %v3400_v40 = vadd.f32 %v4453_v23, %v5922_v58  ;;  %v3391_v57 = vpop.f32.mrb[149].mxu1 }
 0x4c5   : > { %v3392_v44 = vadd.f32 %v5922_v58, %v3391_v57  ;;  %v4454_v62 = vpop.f32.mrb[150].mxu1 }
 0x4c6   : > { %3460 = vst [vmem:[%s5926_s17 + $0xb0] sm:$0xff] %v3400_v40  ;;  %v3403_v19 = vadd.f32 %v4454_v62, %v5922_v58  ;;  %v3394_v27 = vpop.f32.mrb[151].mxu1 }
 0x4c7   : > { %3458 = vst [vmem:[%s5926_s17 + $0xa0] sm:$0xff] %v3392_v44  ;;  %v3395_v61 = vadd.f32 %v5922_v58, %v3394_v27 }
 0x4c8   : > { %3461 = vst [vmem:[%s5926_s17 + $0xb8] sm:$0xff] %v3403_v19 }
 0x4c9   : > { %3459 = vst [vmem:[%s5926_s17 + $0xa8] sm:$0xff] %v3395_v61 }
 0x4d4   : > { %v4457_v14 = vpop.f32.mrb[152].mxu1 }
 0x4d5   : > { %v3416_v47 = vadd.f32 %v4457_v14, %v5922_v58  ;;  %v3407_v29 = vpop.f32.mrb[153].mxu1 }
 0x4d6   : > { %v3408_v28 = vadd.f32 %v5922_v58, %v3407_v29  ;;  %v4458_v49 = vpop.f32.mrb[154].mxu1 }
 0x4d7   : > { %3464 = vst [vmem:[%s5926_s17 + $0xd0] sm:$0xff] %v3416_v47  ;;  %v3419_v3 = vadd.f32 %v4458_v49, %v5922_v58  ;;  %v3410_v4 = vpop.f32.mrb[155].mxu1 }
 0x4d8   : > { %3462 = vst [vmem:[%s5926_s17 + $0xc0] sm:$0xff] %v3408_v28  ;;  %v3411_v30 = vadd.f32 %v5922_v58, %v3410_v4 }
 0x4d9   : > { %3465 = vst [vmem:[%s5926_s17 + $0xd8] sm:$0xff] %v3419_v3 }
 0x4da   : > { %3463 = vst [vmem:[%s5926_s17 + $0xc8] sm:$0xff] %v3411_v30 }
 0x4e4   : > { %v4461_v53 = vpop.f32.mrb[156].mxu1 }
 0x4e5   : > { %v3432_v54 = vadd.f32 %v4461_v53, %v5922_v58  ;;  %v3423_v52 = vpop.f32.mrb[157].mxu1 }
 0x4e6   : > { %v3424_v13 = vadd.f32 %v5922_v58, %v3423_v52  ;;  %v4462_v32 = vpop.f32.mrb[158].mxu1 }
 0x4e7   : > { %3468 = vst [vmem:[%s5926_s17 + $0xf0] sm:$0xff] %v3432_v54  ;;  %v3435_v56 = vadd.f32 %v4462_v32, %v5922_v58  ;;  %v3426_v11 = vpop.f32.mrb[159].mxu1 }
 0x4e8   : > { %3466 = vst [vmem:[%s5926_s17 + $0xe0] sm:$0xff] %v3424_v13  ;;  %v3427_v60 = vadd.f32 %v5922_v58, %v3426_v11 }
 0x4e9   : > { %3469 = vst [vmem:[%s5926_s17 + $0xf8] sm:$0xff] %v3435_v56 }
 0x4ea   : > { %3467 = vst [vmem:[%s5926_s17 + $0xe8] sm:$0xff] %v3427_v60 }
 0x4eb   : > { %5135 = shalt.err (!%p5132_p3)
}
 0x4ec   : > { %s5136_s29 = scalar_lea.hbm %s5991_s27, 4096  ;;  %s5140_s21 = scalar_lea.hbm %s6051_s9, 8192 }
 0x4ed   : > { %p5137_p4 = scmp.ne.s32.totalorder %s5991_s27, %s5136_s29  ;;  %p5141_p9 = scmp.lt.u32.totalorder %s5991_s27, %s6051_s9 }
 0x4ee   : > { %p5142_p10 = scmp.lt.u32.totalorder %s5140_s21, %s5136_s29  ;;  %p5144_p12 = scmp.lt.u32.totalorder %s5136_s29, %s5991_s27 }
 0x4ef   : > { %p5138_p7 = pnand %p5137_p4, %p5277_p5 }
 0x4f0   : > { %p5143_p11 = por %p5142_p10, %p5141_p9 }
 0x4f1   : > { %p5139_p8 = pneg %p5138_p7 }
 0x4f2   : > { %p5145_p13 = por %p5144_p12, %p5143_p11 }
 0x4f4   : > { %p5146_p0 = pnand %p5145_p13, %p5139_p8 }
 0x4f6   : > { %5149 = shalt.err (!%p5146_p0)
}
 0x4f7   : > { %s5187_s24 = smov 128   ;;  %s5188_s28 = smov 8  }
 0x4f8   : > { %4464 = dma.vmem_to_hbm [thread:$0]  (%p5277_p5), %s5993_s22, 4096, %s5991_s27, %s6001_s13, %s5187_s24, %s5187_s24, %s5188_s28  }
 0x4f9 PF: > { %p4470_p1 = scmp.ge.s32.totalorder %s5184_s12, 2  ;;  %s3499_s14 = sand.u32 1, %s5172_s30  }
 0x4fa   : > { %s3500_s26 = scalar_lea.sflag [#allocation3], %s3499_s14 }
 0x4fb   : > { %p4467_p2 = pnand %p4470_p1, %p5281_p6 }
 0x4fd   : > { %5167 = dma.done.wait (!%p4467_p2), %s3500_s26, 4096  }
 0x4fe   : > { %5169 = vsyncadd (!%p4467_p2), %s3500_s26, 4294963200  ;;  %p19_p3 = scmp.ge.s32.totalorder %s5264_s15, 4   ;;  %s6054_s30 = smov %s5176_s10 }
 0x4ff   : > { %s6055_s10 = smov %s5180_s11  ;;  %s6056_s11 = smov %s5275_s18 }
 0x500   : > { %s6057_s12 = smov %s5264_s15  ;;  %21 = sbr.rel (!%p19_p3) target bundleno = 3 (0x3), region = 91 }
 0x507   :  { %3505 = vsyncpa [#allocation3], 1 }
 0x508   :  { %3507 = vsyncpa [#allocation3 + $0x1], 1 }

</bundles_post_ra>
